<compile_context>
chip_gen: v7x
topology: tpu7x:2x2x1
jax: 0.10.0
libtpu: 0.0.40
codegen_flags: <defaults>
</compile_context>

<pallas_src>
import jax
import jax.numpy as jnp
from jax.experimental import pallas as pl
from jax.experimental.pallas import tpu as pltpu


def mlp_kernel(x_ref, w1_ref, b1_ref, w2_ref, b2_ref, o_ref):
    # x_ref : (TM, IN)  batch tile of the input (pipelined over the grid)
    # w1_ref: (H, IN)   fc1.weight (torch layout, out x in)  -- VMEM resident
    # b1_ref: (H, 1)    fc1.bias as a column                 -- VMEM resident
    # w2_ref: (H, 1)    fc2.weight as a column               -- VMEM resident
    # b2_ref: (1, 1)    fc2.bias                             -- SMEM scalar
    # o_ref : (1, TM)   lane-dense output row (batch on the lane axis)

    # fc1 on the MXU, batch on the lane axis, contracting both sides over IN:
    #   hT[H, TM] = sum_IN W1[H, IN] * x[TM, IN]     (f32 accumulation)
    # No materialized transpose of the x tile.
    ht = jax.lax.dot_general(
        w1_ref[...], x_ref[...],
        dimension_numbers=(((1,), (1,)), ((), ())),
        preferred_element_type=jnp.float32,
    )

    # bias + ReLU on the VPU (b1 broadcast along lanes)
    ht = jnp.maximum(ht + b1_ref[...], 0.0)

    # fc2 (out_features == 1): VPU multiply + sublane reduction instead of a
    # near-empty (N=1) MXU matmul; result is already lane-dense (1, TM).
    logits = jnp.sum(ht * w2_ref[...], axis=0, keepdims=True) + b2_ref[0, 0]

    # Exact sigmoid (exp on the EUP; the divide is negligible here) for parity
    # with the PyTorch module.
    o_ref[...] = (1.0 / (1.0 + jnp.exp(-logits))).astype(o_ref.dtype)


def feedforward(x, w1, b1, w2, b2, *, tm=None):
    """Fused MLP forward.

    x : [B, input_size]          activations (f32 or bf16)
    w1: [hidden, input_size]     fc1.weight (torch layout: out x in)
    b1: [hidden]                 fc1.bias
    w2: [1, hidden]              fc2.weight
    b2: [1]                      fc2.bias
    returns [B, 1]  == sigmoid(relu(x @ w1.T + b1) @ w2.T + b2)
    """
    B, IN = x.shape
    H = w1.shape[0]

    if tm is None:
        if B <= 1024:
            # Single grid step: one DMA, no pipeline priming, no padded copy.
            tm = max(8, ((B + 7) // 8) * 8)
        else:
            # Fills the 256-wide MXU on v6e/v7x and keeps DMAs near roofline.
            tm = 512

    n_tiles = pl.cdiv(B, tm)
    out_w = n_tiles * tm  # output row width; lanes >= B are sliced off below

    # (8, 128) block constraints: x block sublane dim and out block lane dim.
    assert tm % 8 == 0, tm
    assert (tm % 128 == 0) or (n_tiles == 1), (tm, n_tiles)

    b1c = b1.reshape(H, 1).astype(jnp.float32)
    w2c = w2.reshape(H, 1).astype(jnp.float32)
    b2s = b2.reshape(1, 1).astype(jnp.float32)

    out = pl.pallas_call(
        mlp_kernel,
        out_shape=jax.ShapeDtypeStruct((1, out_w), x.dtype),
        grid_spec=pltpu.PrefetchScalarGridSpec(
            num_scalar_prefetch=0,
            grid=(n_tiles,),
            in_specs=[
                # x tile: streamed / double-buffered along the batch grid axis.
                # Last partial block (B not a multiple of tm) is handled by
                # Pallas; garbage rows only hit output lanes >= B.
                pl.BlockSpec((tm, IN), lambda i: (i, 0)),
                # weights & biases: constant index_map -> fetched once, VMEM resident
                pl.BlockSpec((H, IN), lambda i: (0, 0)),
                pl.BlockSpec((H, 1), lambda i: (0, 0)),
                pl.BlockSpec((H, 1), lambda i: (0, 0)),
                # fc2 bias: single scalar in SMEM (no padded VMEM tile / DMA)
                pl.BlockSpec(memory_space=pltpu.MemorySpace.SMEM),
            ],
            # lane-dense output: batch on the lane axis, one (1, TM) row per step
            out_specs=pl.BlockSpec((1, tm), lambda i: (0, i)),
        ),
        compiler_params=pltpu.CompilerParams(
            dimension_semantics=("parallel",),
        ),
    )(x, w1, b1c, w2c, b2s)

    # Layout plumbing back to the PyTorch shape [B, 1].
    return out[0, :B].reshape(B, 1)


def feedforward_ref(x, w1, b1, w2, b2):
    h = jnp.maximum(
        jnp.dot(x, w1.T, precision=jax.lax.Precision.HIGHEST) + b1[None, :], 0.0
    )
    z = jnp.dot(h, w2.T, precision=jax.lax.Precision.HIGHEST) + b2[None, :]
    return jax.nn.sigmoid(z)


if __name__ == "__main__":
    # Lane-aligned feature sizes; batch deliberately NOT a multiple of 8 or 128
    # so the no-pad partial-block path is exercised.
    batch = 300
    input_size = 128
    hidden_size = 256

    key = jax.random.PRNGKey(0)
    kx, k1, kb1, k2, kb2 = jax.random.split(key, 5)

    # torch.nn.Linear-style init: U(-1/sqrt(fan_in), 1/sqrt(fan_in)), torch layouts.
    bound1 = 1.0 / float(input_size) ** 0.5
    bound2 = 1.0 / float(hidden_size) ** 0.5
    w1 = jax.random.uniform(k1, (hidden_size, input_size), jnp.float32, -bound1, bound1)
    b1 = jax.random.uniform(kb1, (hidden_size,), jnp.float32, -bound1, bound1)
    w2 = jax.random.uniform(k2, (1, hidden_size), jnp.float32, -bound2, bound2)
    b2 = jax.random.uniform(kb2, (1,), jnp.float32, -bound2, bound2)

    x = jax.random.normal(kx, (batch, input_size), jnp.float32)

    ref = feedforward_ref(x, w1, b1, w2, b2)

    # 1) default auto-tiling: single grid step (tm = round_up(300, 8) = 304).
    out = jax.block_until_ready(feedforward(x, w1, b1, w2, b2))
    assert out.shape == (batch, 1), out.shape
    assert jnp.allclose(out, ref, atol=1e-3, rtol=1e-3), float(
        jnp.max(jnp.abs(out - ref))
    )

    # 2) multi-tile path with a partial (non-8-aligned) last block: grid=(3,).
    out_tiled = jax.block_until_ready(feedforward(x, w1, b1, w2, b2, tm=128))
    assert out_tiled.shape == (batch, 1), out_tiled.shape
    assert jnp.allclose(out_tiled, ref, atol=1e-3, rtol=1e-3), float(
        jnp.max(jnp.abs(out_tiled - ref))
    )

    print("KERNEL_OK")
</pallas_src>

<mosaic_0001>
module attributes {stable_mosaic.version = 11 : i64} {
  func.func @mlp_kernel(%arg0: i32, %arg1: memref<304x128xf32, #tpu.memory_space<vmem>>, %arg2: memref<256x128xf32, #tpu.memory_space<vmem>>, %arg3: memref<256x1xf32, #tpu.memory_space<vmem>>, %arg4: memref<256x1xf32, #tpu.memory_space<vmem>>, %arg5: memref<1x1xf32, #tpu.memory_space<smem>>, %arg6: memref<1x304xf32, #tpu.memory_space<vmem>>) attributes {dimension_semantics = [#tpu.dimension_semantics<parallel>], iteration_bounds = array<i64: 1>, scalar_prefetch = 0 : i64, scratch_operands = 0 : i64, tpu.core_type = #tpu.core_type<tc>, window_params = [{transform_indices = @transform_0, window_bounds = array<i64: 304, 128>}, {pipeline_mode = #tpu.pipeline_mode<synchronous>, transform_indices = @transform_1, window_bounds = array<i64: 256, 128>}, {pipeline_mode = #tpu.pipeline_mode<synchronous>, transform_indices = @transform_2, window_bounds = array<i64: 256, 1>}, {pipeline_mode = #tpu.pipeline_mode<synchronous>, transform_indices = @transform_3, window_bounds = array<i64: 256, 1>}, {transform_indices = @transform_4, window_bounds = array<i64: 1, 1>}, {transform_indices = @transform_5, window_bounds = array<i64: 1, 304>}]} {
    %c0 = arith.constant 0 : index
    %c0_0 = arith.constant 0 : index
    %0 = vector.load %arg2[%c0, %c0_0] : memref<256x128xf32, #tpu.memory_space<vmem>>, vector<256x128xf32>
    %c0_1 = arith.constant 0 : index
    %c0_2 = arith.constant 0 : index
    %1 = vector.load %arg1[%c0_1, %c0_2] : memref<304x128xf32, #tpu.memory_space<vmem>>, vector<304x128xf32>
    %cst = arith.constant dense<0.000000e+00> : vector<256x304xf32>
    %2 = tpu.matmul %0, %1, %cst {dimension_numbers = #tpu.dot_dimension_numbers<[1], [1], [0], [0], [0, 0, 1, 0], [], []>} : vector<256x128xf32>, vector<304x128xf32>, vector<256x304xf32> -> vector<256x304xf32>
    %c0_3 = arith.constant 0 : index
    %c0_4 = arith.constant 0 : index
    %3 = vector.load %arg3[%c0_3, %c0_4] : memref<256x1xf32, #tpu.memory_space<vmem>>, vector<256x1xf32>
    %4 = vector.broadcast %3 : vector<256x1xf32> to vector<256x304xf32>
    %5 = arith.addf %2, %4 : vector<256x304xf32>
    %cst_5 = arith.constant 0.000000e+00 : f32
    %6 = vector.broadcast %cst_5 : f32 to vector<256x304xf32>
    %7 = arith.maximumf %5, %6 : vector<256x304xf32>
    %c0_6 = arith.constant 0 : index
    %c0_7 = arith.constant 0 : index
    %8 = vector.load %arg4[%c0_6, %c0_7] : memref<256x1xf32, #tpu.memory_space<vmem>>, vector<256x1xf32>
    %9 = vector.broadcast %8 : vector<256x1xf32> to vector<256x304xf32>
    %10 = arith.mulf %7, %9 : vector<256x304xf32>
    %cst_8 = arith.constant dense<0.000000e+00> : vector<304xf32>
    %11 = vector.multi_reduction <add>, %10, %cst_8 [0] : vector<256x304xf32> to vector<304xf32>
    %12 = vector.shape_cast %11 : vector<304xf32> to vector<1x304xf32>
    %c0_9 = arith.constant 0 : index
    %c0_10 = arith.constant 0 : index
    %13 = memref.load %arg5[%c0_9, %c0_10] : memref<1x1xf32, #tpu.memory_space<smem>>
    %14 = vector.broadcast %13 : f32 to vector<1x304xf32>
    %15 = arith.addf %12, %14 : vector<1x304xf32>
    %cst_11 = arith.constant 0.000000e+00 : f32
    %16 = vector.broadcast %cst_11 : f32 to vector<1x304xf32>
    %17 = arith.subf %16, %15 : vector<1x304xf32>
    %18 = math.exp %17 : vector<1x304xf32>
    %cst_12 = arith.constant 1.000000e+00 : f32
    %19 = vector.broadcast %cst_12 : f32 to vector<1x304xf32>
    %20 = arith.addf %19, %18 : vector<1x304xf32>
    %cst_13 = arith.constant 1.000000e+00 : f32
    %21 = vector.broadcast %cst_13 : f32 to vector<1x304xf32>
    %22 = arith.divf %21, %20 : vector<1x304xf32>
    %c0_14 = arith.constant 0 : index
    %c0_15 = arith.constant 0 : index
    %23 = vector.load %arg6[%c0_14, %c0_15] : memref<1x304xf32, #tpu.memory_space<vmem>>, vector<1x304xf32>
    tpu.vector_store %arg6[%c0_14, %c0_15], %22 {strides = array<i32>} : memref<1x304xf32, #tpu.memory_space<vmem>>, vector<1x304xf32>,
    return
  }
  func.func @transform_0(%arg0: i32) -> (i32, i32) {
    %c0_i32 = arith.constant 0 : i32
    %c0_i32_0 = arith.constant 0 : i32
    return %arg0, %c0_i32 : i32, i32
  }
  func.func @transform_1(%arg0: i32) -> (i32, i32) {
    %c0_i32 = arith.constant 0 : i32
    %c0_i32_0 = arith.constant 0 : i32
    %c0_i32_1 = arith.constant 0 : i32
    return %c0_i32, %c0_i32_0 : i32, i32
  }
  func.func @transform_2(%arg0: i32) -> (i32, i32) {
    %c0_i32 = arith.constant 0 : i32
    %c0_i32_0 = arith.constant 0 : i32
    %c0_i32_1 = arith.constant 0 : i32
    return %c0_i32, %c0_i32_0 : i32, i32
  }
  func.func @transform_3(%arg0: i32) -> (i32, i32) {
    %c0_i32 = arith.constant 0 : i32
    %c0_i32_0 = arith.constant 0 : i32
    %c0_i32_1 = arith.constant 0 : i32
    return %c0_i32, %c0_i32_0 : i32, i32
  }
  func.func @transform_4(%arg0: i32) -> (i32, i32) {
    %c0_i32 = arith.constant 0 : i32
    %c0_i32_0 = arith.constant 0 : i32
    %c0_i32_1 = arith.constant 0 : i32
    return %c0_i32, %c0_i32_0 : i32, i32
  }
  func.func @transform_5(%arg0: i32) -> (i32, i32) {
    %c0_i32 = arith.constant 0 : i32
    %c0_i32_0 = arith.constant 0 : i32
    return %c0_i32, %arg0 : i32, i32
  }
}

</mosaic_0001>

<bundles_post_ra>
// kernel: tpu_custom_call.1
= control target key start
LH: loop header
LB: loop body
LE: loop exit
PB: predicated region body
PF: predicated region fallthrough
CT: control target
= control target key end

     0   :  { %11 = vsyncpa [#allocation4], 0  ;;  %s2534_s0 = inlined_call_operand.vmem [shape: f32[300,128], index: 0, kind: input, shape index: {}]   ;;  %s2535_s1 = inlined_call_operand.hbm [shape: f32[256,128], index: 1, kind: input, shape index: {}]   ;;  %s2536_s2 = inlined_call_operand.vmem [shape: f32[256,1], index: 2, kind: input, shape index: {}]   ;;  %s2537_s3 = inlined_call_operand.vmem [shape: f32[256,1], index: 3, kind: input, shape index: {}]   ;;  %s2538_s4 = inlined_call_operand.<no memory space> [shape: f32[1,1], index: 4, kind: input, shape index: {}]   ;;  %s2539_s5 = inlined_call_operand.hbm [shape: f32[1,304], index: 5, kind: output, shape index: {}]  }
   0x1   :  { %12 = vsyncpa [#allocation5], 0  ;;  %s1700_s18 = smov [#allocation3]   ;;  %s1652_s22 = scalar_lea.hbm %s2535_s1, 4096 }
   0x2   :  { %s20_s19 = sshll.u32 %s1700_s18, 4  ;;  %p1653_p0 = scmp.ne.s32.totalorder %s2535_s1, %s1652_s22  ;;  %s21_s19 = int_to_ptr.vmem [resolvable:$true] %s20_s19 }
   0x3   :  { %p1656_p1 = scmp.lt.u32.totalorder %s1652_s22, %s2535_s1 }
   0x5   :  { %p1658_p2 = pnand %p1656_p1, %p1653_p0 }
   0x7   :  { %1661 = shalt.err (!%p1658_p2)
}
   0x8   :  { %s1662_s27 = scalar_lea.vmem %s21_s19, 4096  ;;  %p1667_p4 = scmp.lt.s32.totalorder %s21_s19, %s21_s19 }
   0x9   :  { %p1663_p3 = scmp.ne.s32.totalorder %s21_s19, %s1662_s27  ;;  %p1668_p5 = scmp.lt.s32.totalorder %s1662_s27, %s1662_s27 }
   0xb   :  { %p1669_p6 = por %p1668_p5, %p1667_p4 }
   0xd   :  { %p1670_p7 = pnand %p1669_p6, %p1663_p3 }
   0xf   :  { %1673 = shalt.err (!%p1670_p7)
}
  0x10   :  { %s1701_s28 = smov 128   ;;  %s1702_s29 = smov 8  }
  0x11   :  { %26 = dma.hbm_to_vmem [thread:$0]  %s2535_s1, 4096, %s21_s19, [#allocation4], %s1701_s28, %s1701_s28, %s1702_s29  }
  0x12   :  { %1696 = dma.done.wait [#allocation4], 4096  }
  0x13   :  { %1697 = vsyncadd [#allocation4], 4294963200  ;;  %v1703_v0 = vmov 0   ;;  %v84_v1 = vld [vmem:[%s2534_s0 + $0x80] sm:$0xff]  ;;  %v85_v2 = vld [vmem:[%s2534_s0 + $0x88] sm:$0xff]  ;;  %vm1238_vm0 = vcmask 392192  }
  0x14   :  { %1638 = vset.pattern.permute.xlu0 %v1703_v0  ;;  %1639 = vset.pattern.permute.xlu1 %v1703_v0  ;;  %v68_v3 = vld [vmem:[%s2534_s0] sm:$0xff]  ;;  %v1572_v4 = vpack.c.bf16 %v85_v2, %v84_v1  ;;  %v69_v5 = vld [vmem:[%s2534_s0 + $0x8] sm:$0xff]  ;;  %v86_v6 = vld [vmem:[%s2534_s0 + $0x90] sm:$0xff] }
  0x15   :  { %v87_v7 = vld [vmem:[%s2534_s0 + $0x98] sm:$0xff]  ;;  %v1574_v8 = vpack.c.bf16 %v69_v5, %v68_v3  ;;  %v106_v10 = vld [vmem:[%s2536_s2] sm:$0xff]  ;;  %v108_v11 = vld [vmem:[%s2536_s2 + $0x10] sm:$0xff] }
  0x16   :  { %v1576_v9 = vpack.c.bf16 %v87_v7, %v86_v6  ;;  %1573 = vmatprep.subr.bf16.mxu0 %v1572_v4  ;;  %1616 = vmatprep.subr.bf16.mxu1 %v1572_v4  ;;  %v70_v12 = vld [vmem:[%s2534_s0 + $0x10] sm:$0xff]  ;;  %v71_v13 = vld [vmem:[%s2534_s0 + $0x18] sm:$0xff]  ;;  %v88_v14 = vld [vmem:[%s2534_s0 + $0xa0] sm:$0xff] }
  0x17   :  { %1575 = vmatpush3.bf16.xpose.msra.mxu0 %v1574_v8  ;;  %1624 = vmatpush3.bf16.xpose.msra.mxu1 %v1574_v8  ;;  %v89_v15 = vld [vmem:[%s2534_s0 + $0xa8] sm:$0xff]  ;;  %v109_v17 = vld [vmem:[%s2536_s2 + $0x18] sm:$0xff]  ;;  %v1578_v18 = vpack.c.bf16 %v71_v13, %v70_v12  ;;  %v110_v20 = vld [vmem:[%s2536_s2 + $0x20] sm:$0xff] }
  0x18   :  { %1577 = vmatprep.subr.bf16.mxu0 %v1576_v9  ;;  %1617 = vmatprep.subr.bf16.mxu1 %v1576_v9  ;;  %v107_v16 = vld [vmem:[%s2536_s2 + $0x8] sm:$0xff]  ;;  %v1580_v19 = vpack.c.bf16 %v89_v15, %v88_v14  ;;  %v72_v22 = vld [vmem:[%s2534_s0 + $0x20] sm:$0xff]  ;;  %v90_v24 = vld [vmem:[%s2534_s0 + $0xb0] sm:$0xff] }
  0x19   :  { %140 = vperm.xlu0 %1638, %v106_v10   ;;  %150 = vperm.xlu1 %1639, %v108_v11   ;;  %v111_v21 = vld [vmem:[%s2536_s2 + $0x28] sm:$0xff]  ;;  %v91_v25 = vld [vmem:[%s2534_s0 + $0xb8] sm:$0xff]  ;;  %v112_v26 = vld [vmem:[%s2536_s2 + $0x30] sm:$0xff] }
  0x1a   :  { %v73_v23 = vld [vmem:[%s2534_s0 + $0x28] sm:$0xff]  ;;  %v113_v27 = vld [vmem:[%s2536_s2 + $0x38] sm:$0xff]  ;;  %v1584_v29 = vpack.c.bf16 %v91_v25, %v90_v24  ;;  %v114_v30 = vld [vmem:[%s2536_s2 + $0x40] sm:$0xff] }
  0x1b   :  { %v1582_v28 = vpack.c.bf16 %v73_v23, %v72_v22  ;;  %v115_v31 = vld [vmem:[%s2536_s2 + $0x48] sm:$0xff]  ;;  %v1820_v32 = vld [vmem:[#allocation3] sm:$0xff]  ;;  %v74_v34 = vld [vmem:[%s2534_s0 + $0x30] sm:$0xff] }
  0x1c   :  { %v1822_v33 = vld [vmem:[#allocation3 + $0xc0] sm:$0xff]  ;;  %v75_v35 = vld [vmem:[%s2534_s0 + $0x38] sm:$0xff]  ;;  %v93_v37 = vld [vmem:[%s2534_s0 + $0xc8] sm:$0xff]  ;;  %1410 = vmatprep.mubr.f32.mxu0 %v1820_v32 }
  0x1d   :  { %145 = vperm.xlu0 %1638, %v107_v16   ;;  %155 = vperm.xlu1 %1639, %v109_v17   ;;  %v92_v36 = vld [vmem:[%s2534_s0 + $0xc0] sm:$0xff]  ;;  %v116_v38 = vld [vmem:[%s2536_s2 + $0x50] sm:$0xff]  ;;  %v117_v39 = vld [vmem:[%s2536_s2 + $0x58] sm:$0xff]  ;;  %v1586_v40 = vpack.c.bf16 %v75_v35, %v74_v34 }
  0x1e   :  { %1458 = vmatprep.mubr.f32.mxu1 %v1822_v33  ;;  %v1588_v41 = vpack.c.bf16 %v93_v37, %v92_v36  ;;  %v118_v42 = vld [vmem:[%s2536_s2 + $0x60] sm:$0xff]  ;;  %v119_v43 = vld [vmem:[%s2536_s2 + $0x68] sm:$0xff]  ;;  %v94_v46 = vld [vmem:[%s2534_s0 + $0xd0] sm:$0xff] }
  0x1f   :  { %1579 = vmatpush3.bf16.xpose.msra.mxu0 %v1578_v18  ;;  %1625 = vmatpush3.bf16.xpose.msra.mxu1 %v1578_v18  ;;  %v76_v44 = vld [vmem:[%s2534_s0 + $0x40] sm:$0xff]  ;;  %v77_v45 = vld [vmem:[%s2534_s0 + $0x48] sm:$0xff]  ;;  %v95_v47 = vld [vmem:[%s2534_s0 + $0xd8] sm:$0xff] }
  0x20   :  { %1581 = vmatprep.subr.bf16.mxu0 %v1580_v19  ;;  %1618 = vmatprep.subr.bf16.mxu1 %v1580_v19  ;;  %v120_v48 = vld [vmem:[%s2536_s2 + $0x70] sm:$0xff]  ;;  %v121_v49 = vld [vmem:[%s2536_s2 + $0x78] sm:$0xff]  ;;  %v1590_v50 = vpack.c.bf16 %v77_v45, %v76_v44  ;;  %v1592_v51 = vpack.c.bf16 %v95_v47, %v94_v46  ;;  %v122_v52 = vld [vmem:[%s2536_s2 + $0x80] sm:$0xff] }
  0x21   :  { %160 = vperm.xlu0 %1638, %v110_v20   ;;  %165 = vperm.xlu1 %1639, %v111_v21   ;;  %v123_v53 = vld [vmem:[%s2536_s2 + $0x88] sm:$0xff]  ;;  %v78_v54 = vld [vmem:[%s2534_s0 + $0x50] sm:$0xff]  ;;  %v79_v55 = vld [vmem:[%s2534_s0 + $0x58] sm:$0xff] }
  0x22   :  { %v96_v56 = vld [vmem:[%s2534_s0 + $0xe0] sm:$0xff]  ;;  %v97_v57 = vld [vmem:[%s2534_s0 + $0xe8] sm:$0xff]  ;;  %v124_v58 = vld [vmem:[%s2536_s2 + $0x90] sm:$0xff]  ;;  %v1594_v60 = vpack.c.bf16 %v79_v55, %v78_v54 }
  0x23   :  { %v876_v59 = vld [vmem:[%s2537_s3] sm:$0xff]  ;;  %v1596_v61 = vpack.c.bf16 %v97_v57, %v96_v56  ;;  %v877_v62 = vld [vmem:[%s2537_s3 + $0x8] sm:$0xff]  ;;  %v878_v63 = vld [vmem:[%s2537_s3 + $0x10] sm:$0xff] }
  0x24   :  { %v80_v0 = vld [vmem:[%s2534_s0 + $0x60] sm:$0xff]  ;;  %v81_v1 = vld [vmem:[%s2534_s0 + $0x68] sm:$0xff]  ;;  %v98_v2 = vld [vmem:[%s2534_s0 + $0xf0] sm:$0xff] }
  0x25   :  { %170 = vperm.xlu0 %1638, %v112_v26   ;;  %175 = vperm.xlu1 %1639, %v113_v27   ;;  %v99_v3 = vld [vmem:[%s2534_s0 + $0xf8] sm:$0xff]  ;;  %v880_v5 = vld [vmem:[%s2537_s3 + $0x20] sm:$0xff]  ;;  %v1598_v6 = vpack.c.bf16 %v81_v1, %v80_v0  ;;  %v881_v8 = vld [vmem:[%s2537_s3 + $0x28] sm:$0xff] }
  0x26   :  { %v879_v4 = vld [vmem:[%s2537_s3 + $0x18] sm:$0xff]  ;;  %v1600_v7 = vpack.c.bf16 %v99_v3, %v98_v2  ;;  %v882_v9 = vld [vmem:[%s2537_s3 + $0x30] sm:$0xff]  ;;  %v100_v12 = vld [vmem:[%s2534_s0 + $0x100] sm:$0xff] }
  0x27   :  { %1583 = vmatpush3.bf16.xpose.msra.mxu0 %v1582_v28  ;;  %1626 = vmatpush3.bf16.xpose.msra.mxu1 %v1582_v28  ;;  %v82_v10 = vld [vmem:[%s2534_s0 + $0x70] sm:$0xff]  ;;  %v83_v11 = vld [vmem:[%s2534_s0 + $0x78] sm:$0xff]  ;;  %v101_v13 = vld [vmem:[%s2534_s0 + $0x108] sm:$0xff] }
  0x28   :  { %1585 = vmatprep.subr.bf16.mxu0 %v1584_v29  ;;  %1619 = vmatprep.subr.bf16.mxu1 %v1584_v29  ;;  %v883_v14 = vld [vmem:[%s2537_s3 + $0x38] sm:$0xff]  ;;  %v884_v15 = vld [vmem:[%s2537_s3 + $0x40] sm:$0xff]  ;;  %v1602_v16 = vpack.c.bf16 %v83_v11, %v82_v10  ;;  %v1604_v17 = vpack.c.bf16 %v101_v13, %v100_v12  ;;  %v885_v18 = vld [vmem:[%s2537_s3 + $0x48] sm:$0xff] }
  0x29   :  { %180 = vperm.xlu0 %1638, %v114_v30   ;;  %185 = vperm.xlu1 %1639, %v115_v31   ;;  %v886_v19 = vld [vmem:[%s2537_s3 + $0x50] sm:$0xff]  ;;  %v887_v20 = vld [vmem:[%s2537_s3 + $0x58] sm:$0xff]  ;;  %v888_v21 = vld [vmem:[%s2537_s3 + $0x60] sm:$0xff] }
  0x2a   :  { %v1952_v22 = vld [vmem:[#allocation3 + $0x8] sm:$0xff]  ;;  %v102_v24 = vld [vmem:[%s2534_s0 + $0x110] sm:$0xff]  ;;  %v103_v25 = vld [vmem:[%s2534_s0 + $0x118] sm:$0xff] }
  0x2b   :  { %v1954_v23 = vld [vmem:[#allocation3 + $0xc8] sm:$0xff]  ;;  %v890_v27 = vld [vmem:[%s2537_s3 + $0x70] sm:$0xff]  ;;  %v1608_v30 = vpack.c.bf16 %v103_v25, %v102_v24  ;;  %v891_v31 = vld [vmem:[%s2537_s3 + $0x78] sm:$0xff] }
  0x2c   :  { %v889_v26 = vld [vmem:[%s2537_s3 + $0x68] sm:$0xff]  ;;  %v1972_v28 = vld [vmem:[#allocation3 + $0x10] sm:$0xff]  ;;  %v892_v34 = vld [vmem:[%s2537_s3 + $0x80] sm:$0xff] }
  0x2d   :  { %190 = vperm.xlu0 %1638, %v116_v38   ;;  %195 = vperm.xlu1 %1639, %v117_v39   ;;  %v1974_v29 = vld [vmem:[#allocation3 + $0xd0] sm:$0xff]  ;;  %v1986_v35 = vld [vmem:[#allocation3 + $0x18] sm:$0xff]  ;;  %v104_v37 = vld [vmem:[%s2534_s0 + $0x120] sm:$0xff] }
  0x2e   :  { %v1988_v36 = vld [vmem:[#allocation3 + $0xd8] sm:$0xff]  ;;  %v105_v38 = vld [vmem:[%s2534_s0 + $0x128] sm:$0xff]  ;;  %v126_v44 = vld [vmem:[%s2536_s2 + $0xa0] sm:$0xff] }
  0x2f   :  { %1587 = vmatpush3.bf16.xpose.msra.mxu0 %v1586_v40  ;;  %1627 = vmatpush3.bf16.xpose.msra.mxu1 %v1586_v40  ;;  %v125_v39 = vld [vmem:[%s2536_s2 + $0x98] sm:$0xff]  ;;  %v893_v40 = vld [vmem:[%s2537_s3 + $0x88] sm:$0xff]  ;;  %v894_v45 = vld [vmem:[%s2537_s3 + $0x90] sm:$0xff] }
  0x30   :  { %1589 = vmatprep.subr.bf16.mxu0 %v1588_v41  ;;  %1620 = vmatprep.subr.bf16.mxu1 %v1588_v41  ;;  %v2006_v41 = vld [vmem:[#allocation3 + $0x20] sm:$0xff]  ;;  %v41_v46 = vld [vmem:[#allocation3 + $0x28] sm:$0xff]  ;;  %v43_v54 = vld [vmem:[#allocation3 + $0x38] sm:$0xff] }
  0x31   :  { %200 = vperm.xlu0 %1638, %v118_v42   ;;  %205 = vperm.xlu1 %1639, %v119_v43   ;;  %v2008_v42 = vld [vmem:[#allocation3 + $0xe0] sm:$0xff]  ;;  %v1612_v43 = vpack.c.bf16 %v105_v38, %v104_v37  ;;  %v2020_v47 = vld [vmem:[#allocation3 + $0xe8] sm:$0xff]  ;;  %v2041_v55 = vld [vmem:[#allocation3 + $0xf8] sm:$0xff] }
  0x32   :  { %v129_v56 = vld [vmem:[%s2536_s2 + $0xb8] sm:$0xff]  ;;  %v897_v57 = vld [vmem:[%s2537_s3 + $0xa8] sm:$0xff]  ;;  %v46_v0 = vld [vmem:[#allocation3 + $0x50] sm:$0xff] }
  0x33   :  { %v900_v1 = vld [vmem:[%s2537_s3 + $0xc0] sm:$0xff]  ;;  %v47_v2 = vld [vmem:[#allocation3 + $0x58] sm:$0xff]  ;;  %v50_v11 = vld [vmem:[#allocation3 + $0x70] sm:$0xff] }
  0x34   :  { %v133_v3 = vld [vmem:[%s2536_s2 + $0xd8] sm:$0xff]  ;;  %v136_v12 = vld [vmem:[%s2536_s2 + $0xf0] sm:$0xff]  ;;  %v904_v13 = vld [vmem:[%s2537_s3 + $0xe0] sm:$0xff] }
  0x35   :  { %210 = vperm.xlu0 %1638, %v120_v48   ;;  %215 = vperm.xlu1 %1639, %v121_v49   ;;  %v127_v48 = vld [vmem:[%s2536_s2 + $0xa8] sm:$0xff]  ;;  %v895_v49 = vld [vmem:[%s2537_s3 + $0x98] sm:$0xff]  ;;  %v56_v24 = vld [vmem:[#allocation3 + $0xa0] sm:$0xff] }
  0x36   :  { %v903_v10 = vld [vmem:[%s2537_s3 + $0xd8] sm:$0xff]  ;;  %v57_v25 = vld [vmem:[#allocation3 + $0xa8] sm:$0xff] }
  0x37   :  { %1591 = vmatpush3.bf16.xpose.msra.mxu0 %v1590_v50  ;;  %1628 = vmatpush3.bf16.xpose.msra.mxu1 %v1590_v50  ;;  %v42_v50 = vld [vmem:[#allocation3 + $0x30] sm:$0xff] }
  0x38   :  { %1593 = vmatprep.subr.bf16.mxu0 %v1592_v51  ;;  %1621 = vmatprep.subr.bf16.mxu1 %v1592_v51  ;;  %v2031_v51 = vld [vmem:[#allocation3 + $0xf0] sm:$0xff] }
  0x39   :  { %220 = vperm.xlu0 %1638, %v122_v52   ;;  %225 = vperm.xlu1 %1639, %v123_v53   ;;  %v128_v52 = vld [vmem:[%s2536_s2 + $0xb0] sm:$0xff]  ;;  %v896_v53 = vld [vmem:[%s2537_s3 + $0xa0] sm:$0xff] }
  0x3d   :  { %230 = vperm.xlu0 %1638, %v124_v58   ;;  %910 = vperm.xlu1 %1639, %v876_v59   ;;  %v44_v58 = vld [vmem:[#allocation3 + $0x40] sm:$0xff] }
  0x3e   :  { %v130_v59 = vld [vmem:[%s2536_s2 + $0xc0] sm:$0xff] }
  0x3f   :  { %1595 = vmatpush3.bf16.xpose.msra.mxu0 %v1594_v60  ;;  %1629 = vmatpush3.bf16.xpose.msra.mxu1 %v1594_v60  ;;  %v898_v60 = vld [vmem:[%s2537_s3 + $0xb0] sm:$0xff] }
  0x40   :  { %1597 = vmatprep.subr.bf16.mxu0 %v1596_v61  ;;  %1622 = vmatprep.subr.bf16.mxu1 %v1596_v61  ;;  %v45_v61 = vld [vmem:[#allocation3 + $0x48] sm:$0xff] }
  0x41   :  { %915 = vperm.xlu0 %1638, %v877_v62   ;;  %920 = vperm.xlu1 %1639, %v878_v63   ;;  %v131_v62 = vld [vmem:[%s2536_s2 + $0xc8] sm:$0xff]  ;;  %v899_v63 = vld [vmem:[%s2537_s3 + $0xb8] sm:$0xff] }
  0x45   :  { %925 = vperm.xlu0 %1638, %v879_v4   ;;  %930 = vperm.xlu1 %1639, %v880_v5   ;;  %v901_v4 = vld [vmem:[%s2537_s3 + $0xc8] sm:$0xff]  ;;  %v48_v5 = vld [vmem:[#allocation3 + $0x60] sm:$0xff] }
  0x47   :  { %1599 = vmatpush3.bf16.xpose.msra.mxu0 %v1598_v6  ;;  %1630 = vmatpush3.bf16.xpose.msra.mxu1 %v1598_v6  ;;  %v134_v6 = vld [vmem:[%s2536_s2 + $0xe0] sm:$0xff] }
  0x48   :  { %1601 = vmatprep.subr.bf16.mxu0 %v1600_v7  ;;  %1623 = vmatprep.subr.bf16.mxu1 %v1600_v7  ;;  %v902_v7 = vld [vmem:[%s2537_s3 + $0xd0] sm:$0xff] }
  0x49   :  { %935 = vperm.xlu0 %1638, %v881_v8   ;;  %940 = vperm.xlu1 %1639, %v882_v9   ;;  %v49_v8 = vld [vmem:[#allocation3 + $0x68] sm:$0xff] }
  0x4a   :  { %v135_v9 = vld [vmem:[%s2536_s2 + $0xe8] sm:$0xff] }
  0x4d   :  { %945 = vperm.xlu0 %1638, %v883_v14   ;;  %950 = vperm.xlu1 %1639, %v884_v15   ;;  %v51_v14 = vld [vmem:[#allocation3 + $0x78] sm:$0xff] }
  0x4e   :  { %v137_v15 = vld [vmem:[%s2536_s2 + $0xf8] sm:$0xff] }
  0x4f   :  { %1603 = vmatpush3.bf16.xpose.msra.mxu0 %v1602_v16  ;;  %1631 = vmatpush3.bf16.xpose.msra.mxu1 %v1602_v16  ;;  %v905_v16 = vld [vmem:[%s2537_s3 + $0xe8] sm:$0xff] }
  0x50   :  { %1605 = vmatprep.subr.bf16.mxu1 %v1604_v17 }
  0x51   :  { %955 = vperm.xlu0 %1638, %v885_v18   ;;  %960 = vperm.xlu1 %1639, %v886_v19   ;;  %v906_v18 = vld [vmem:[%s2537_s3 + $0xf0] sm:$0xff]  ;;  %v907_v19 = vld [vmem:[%s2537_s3 + $0xf8] sm:$0xff] }
  0x55   :  { %965 = vperm.xlu0 %1638, %v887_v20   ;;  %970 = vperm.xlu1 %1639, %v888_v21   ;;  %v53_v20 = vld [vmem:[#allocation3 + $0x88] sm:$0xff]  ;;  %v54_v21 = vld [vmem:[#allocation3 + $0x90] sm:$0xff] }
  0x56   :  { %1411 = vmatmul.mubr.f32.vlgmr.msra.gmra.mrb[0].mxu0 %v1820_v32  ;;  %1459 = vmatmul.mubr.f32.vlgmr.msra.gmra.mrb[0].mxu1 %v1822_v33 }
  0x57   :  { %1412 = vmatprep.mubr.f32.mxu0 %v1952_v22  ;;  %1460 = vmatprep.mubr.f32.mxu1 %v1954_v23 }
  0x58   :  { %1607 = vmatpush3.bf16.xpose.msra.mxu1 %v1604_v17  ;;  %v52_v17 = vld [vmem:[#allocation3 + $0x80] sm:$0xff] }
  0x59   :  { %975 = vperm.xlu0 %1638, %v889_v26   ;;  %980 = vperm.xlu1 %1639, %v890_v27   ;;  %v58_v26 = vld [vmem:[#allocation3 + $0xb0] sm:$0xff] }
  0x5a   :  { %1413 = vmatmul.mubr.f32.gmra.mrb[2].mxu0 %v1952_v22  ;;  %1461 = vmatmul.mubr.f32.gmra.mrb[2].mxu1 %v1954_v23 }
  0x5b   :  { %1414 = vmatprep.mubr.f32.mxu0 %v1972_v28  ;;  %1462 = vmatprep.mubr.f32.mxu1 %v1974_v29 }
  0x5c   :  { %1609 = vmatprep.subr.bf16.mxu1 %v1608_v30 }
  0x5d   :  { %985 = vperm.xlu0 %1638, %v891_v31   ;;  %990 = vperm.xlu1 %1639, %v892_v34  }
  0x5e   :  { %1415 = vmatmul.mubr.f32.gmra.mrb[4].mxu0 %v1972_v28  ;;  %1463 = vmatmul.mubr.f32.gmra.mrb[4].mxu1 %v1974_v29 }
  0x5f   :  { %1416 = vmatprep.mubr.f32.mxu0 %v1986_v35  ;;  %1464 = vmatprep.mubr.f32.mxu1 %v1988_v36 }
  0x60   :  { %1611 = vmatpush3.bf16.xpose.msra.mxu1 %v1608_v30 }
  0x61   :  { %235 = vperm.xlu0 %1638, %v125_v39   ;;  %995 = vperm.xlu1 %1639, %v893_v40  }
  0x62   :  { %1417 = vmatmul.mubr.f32.gmra.mrb[6].mxu0 %v1986_v35  ;;  %1465 = vmatmul.mubr.f32.gmra.mrb[6].mxu1 %v1988_v36 }
  0x63   :  { %1418 = vmatprep.mubr.f32.mxu0 %v2006_v41  ;;  %1466 = vmatprep.mubr.f32.mxu1 %v2008_v42 }
  0x64   :  { %1613 = vmatprep.subr.bf16.mxu1 %v1612_v43 }
  0x65   :  { %240 = vperm.xlu0 %1638, %v126_v44   ;;  %1000 = vperm.xlu1 %1639, %v894_v45  }
  0x66   :  { %1419 = vmatmul.mubr.f32.gmra.mrb[8].mxu0 %v2006_v41  ;;  %1467 = vmatmul.mubr.f32.gmra.mrb[8].mxu1 %v2008_v42 }
  0x67   :  { %1420 = vmatprep.mubr.f32.mxu0 %v41_v46  ;;  %1468 = vmatprep.mubr.f32.mxu1 %v2020_v47 }
  0x68   :  { %1615 = vmatpush3.bf16.xpose.msra.mxu1 %v1612_v43 }
  0x69   :  { %245 = vperm.xlu0 %1638, %v127_v48   ;;  %1005 = vperm.xlu1 %1639, %v895_v49  }
  0x6a   :  { %1421 = vmatmul.mubr.f32.gmra.mrb[10].mxu0 %v41_v46  ;;  %1469 = vmatmul.mubr.f32.gmra.mrb[10].mxu1 %v2020_v47 }
  0x6b   :  { %1422 = vmatprep.mubr.f32.mxu0 %v42_v50  ;;  %1470 = vmatprep.mubr.f32.mxu1 %v2031_v51 }
  0x6d   :  { %250 = vperm.xlu0 %1638, %v128_v52   ;;  %1010 = vperm.xlu1 %1639, %v896_v53  }
  0x6e   :  { %1423 = vmatmul.mubr.f32.gmra.mrb[12].mxu0 %v42_v50  ;;  %1471 = vmatmul.mubr.f32.gmra.mrb[12].mxu1 %v2031_v51 }
  0x6f   :  { %1424 = vmatprep.mubr.f32.mxu0 %v43_v54  ;;  %1472 = vmatprep.mubr.f32.mxu1 %v2041_v55 }
  0x71   :  { %255 = vperm.xlu0 %1638, %v129_v56   ;;  %1015 = vperm.xlu1 %1639, %v897_v57  }
  0x72   :  { %1425 = vmatmul.mubr.f32.gmra.mrb[14].mxu0 %v43_v54  ;;  %1473 = vmatmul.mubr.f32.gmra.mrb[14].mxu1 %v2041_v55 }
  0x73   :  { %1426 = vmatprep.mubr.f32.mxu0 %v44_v58  ;;  %1524 = vmatprep.mubr.f32.mxu1 %v1820_v32  ;;  %v132_v32 = vld [vmem:[%s2536_s2 + $0xd0] sm:$0xff] }
  0x75   :  { %260 = vperm.xlu0 %1638, %v130_v59   ;;  %1020 = vperm.xlu1 %1639, %v898_v60  }
  0x76   :  { %1427 = vmatmul.mubr.f32.gmra.mrb[16].mxu0 %v44_v58  ;;  %1525 = vmatmul.mubr.f32.vlgmr.msra.gmra.mrb[16].mxu1 %v1952_v22  ;;  %v55_v22 = vld [vmem:[#allocation3 + $0x98] sm:$0xff] }
  0x77   :  { %1428 = vmatprep.mubr.f32.mxu0 %v45_v61  ;;  %1527 = vmatprep.mubr.f32.mxu1 %v1972_v28  ;;  %v59_v28 = vld [vmem:[#allocation3 + $0xb8] sm:$0xff] }
  0x79   :  { %265 = vperm.xlu0 %1638, %v131_v62   ;;  %1025 = vperm.xlu1 %1639, %v899_v63  }
  0x7a   :  { %1429 = vmatmul.mubr.f32.gmra.mrb[18].mxu0 %v45_v61  ;;  %1528 = vmatmul.mubr.f32.gmra.mrb[18].mxu1 %v1986_v35 }
  0x7b   :  { %1430 = vmatprep.mubr.f32.mxu0 %v46_v0  ;;  %1530 = vmatprep.mubr.f32.mxu1 %v2006_v41 }
  0x7d   :  { %270 = vperm.xlu0 %1638, %v132_v32   ;;  %1030 = vperm.xlu1 %1639, %v900_v1  }
  0x7e   :  { %1431 = vmatmul.mubr.f32.gmra.mrb[20].mxu0 %v46_v0  ;;  %1531 = vmatmul.mubr.f32.gmra.mrb[20].mxu1 %v41_v46 }
  0x7f   :  { %1432 = vmatprep.mubr.f32.mxu0 %v47_v2  ;;  %1533 = vmatprep.mubr.f32.mxu1 %v42_v50 }
  0x81   :  { %275 = vperm.xlu0 %1638, %v133_v3   ;;  %1035 = vperm.xlu1 %1639, %v901_v4  }
  0x82   :  { %1433 = vmatmul.mubr.f32.gmra.mrb[22].mxu0 %v47_v2  ;;  %1534 = vmatmul.mubr.f32.gmra.mrb[22].mxu1 %v43_v54 }
  0x83   :  { %1434 = vmatprep.mubr.f32.mxu0 %v48_v5  ;;  %1536 = vmatprep.mubr.f32.mxu1 %v44_v58 }
  0x85   :  { %280 = vperm.xlu0 %1638, %v134_v6   ;;  %1040 = vperm.xlu1 %1639, %v902_v7  }
  0x86   :  { %1435 = vmatmul.mubr.f32.gmra.mrb[24].mxu0 %v48_v5  ;;  %1537 = vmatmul.mubr.f32.gmra.mrb[24].mxu1 %v45_v61 }
  0x87   :  { %1436 = vmatprep.mubr.f32.mxu0 %v49_v8  ;;  %1539 = vmatprep.mubr.f32.mxu1 %v46_v0 }
  0x89   :  { %285 = vperm.xlu0 %1638, %v135_v9   ;;  %1045 = vperm.xlu1 %1639, %v903_v10  }
  0x8a   :  { %1437 = vmatmul.mubr.f32.gmra.mrb[26].mxu0 %v49_v8  ;;  %1540 = vmatmul.mubr.f32.gmra.mrb[26].mxu1 %v47_v2 }
  0x8b   :  { %1438 = vmatprep.mubr.f32.mxu0 %v50_v11  ;;  %1542 = vmatprep.mubr.f32.mxu1 %v48_v5 }
  0x8d   :  { %290 = vperm.xlu0 %1638, %v136_v12   ;;  %1050 = vperm.xlu1 %1639, %v904_v13  }
  0x8e   :  { %1439 = vmatmul.mubr.f32.gmra.mrb[28].mxu0 %v50_v11  ;;  %1543 = vmatmul.mubr.f32.gmra.mrb[28].mxu1 %v49_v8 }
  0x8f   :  { %1440 = vmatprep.mubr.f32.mxu0 %v51_v14  ;;  %1545 = vmatprep.mubr.f32.mxu1 %v50_v11 }
  0x91   :  { %295 = vperm.xlu0 %1638, %v137_v15   ;;  %1055 = vperm.xlu1 %1639, %v905_v16  }
  0x92   :  { %1441 = vmatmul.mubr.f32.gmra.mrb[30].mxu0 %v51_v14  ;;  %1546 = vmatmul.mubr.f32.gmra.mrb[30].mxu1 %v51_v14 }
  0x93   :  { %1442 = vmatprep.mubr.f32.mxu0 %v52_v17  ;;  %1548 = vmatprep.mubr.f32.mxu1 %v52_v17 }
  0x95   :  { %1060 = vperm.xlu0 %1638, %v906_v18   ;;  %1065 = vperm.xlu1 %1639, %v907_v19  }
  0x96   :  { %1443 = vmatmul.mubr.f32.gmra.mrb[32].mxu0 %v52_v17  ;;  %1549 = vmatmul.mubr.f32.gmra.mrb[32].mxu1 %v53_v20 }
  0x97   :  { %1444 = vmatprep.mubr.f32.mxu0 %v53_v20  ;;  %1551 = vmatprep.mubr.f32.mxu1 %v54_v21 }
  0x98   :  { %v2111_v27 = vpop.permute.xlu1 %150  ;;  %v2114_v30 = vpop.permute.xlu0 %140 }
  0x9a   :  { %1445 = vmatmul.mubr.f32.gmra.mrb[34].mxu0 %v53_v20  ;;  %1552 = vmatmul.mubr.f32.gmra.mrb[34].mxu1 %v55_v22 }
  0x9b   :  { %1446 = vmatprep.mubr.f32.mxu0 %v54_v21  ;;  %1554 = vmatprep.mubr.f32.mxu1 %v56_v24 }
  0x9c   :  { %v2116_v31 = vpop.permute.xlu1 %155  ;;  %v2120_v34 = vpop.permute.xlu0 %145 }
  0x9e   :  { %1447 = vmatmul.mubr.f32.gmra.mrb[36].mxu0 %v54_v21  ;;  %1555 = vmatmul.mubr.f32.gmra.mrb[36].mxu1 %v57_v25 }
  0x9f   :  { %1448 = vmatprep.mubr.f32.mxu0 %v55_v22  ;;  %1557 = vmatprep.mubr.f32.mxu1 %v58_v26 }
  0xa0   :  { %v2122_v35 = vpop.permute.xlu1 %165 }
  0xa2   :  { %1449 = vmatmul.mubr.f32.gmra.mrb[38].mxu0 %v55_v22  ;;  %1558 = vmatmul.mubr.f32.gmra.mrb[38].mxu1 %v59_v28 }
  0xa3   :  { %1450 = vmatprep.mubr.f32.mxu0 %v56_v24  ;;  %1560 = vmatprep.mubr.f32.mxu1 %v1822_v33  ;;  %v2128_v33 = vpop.permute.xlu0 %160 }
  0xa6   :  { %1451 = vmatmul.mubr.f32.gmra.mrb[40].mxu0 %v56_v24  ;;  %1561 = vmatmul.mubr.f32.gmra.mrb[40].mxu1 %v1954_v23  ;;  %v2130_v23 = vpop.permute.xlu1 %175 }
  0xa7   :  { %1452 = vmatprep.mubr.f32.mxu0 %v57_v25  ;;  %1563 = vmatprep.mubr.f32.mxu1 %v1974_v29  ;;  %v2133_v29 = vpop.permute.xlu0 %170 }
  0xaa   :  { %1453 = vmatmul.mubr.f32.gmra.mrb[42].mxu0 %v57_v25  ;;  %1564 = vmatmul.mubr.f32.gmra.mrb[42].mxu1 %v1988_v36  ;;  %v2135_v37 = vpop.permute.xlu1 %185 }
  0xab   :  { %1454 = vmatprep.mubr.f32.mxu0 %v58_v26  ;;  %1566 = vmatprep.mubr.f32.mxu1 %v2008_v42  ;;  %v2137_v36 = vpop.permute.xlu0 %180 }
  0xae   :  { %1455 = vmatmul.mubr.f32.gmra.mrb[44].mxu0 %v58_v26  ;;  %1567 = vmatmul.mubr.f32.gmra.mrb[44].mxu1 %v2020_v47  ;;  %v2139_v38 = vpop.permute.xlu1 %195 }
  0xaf   :  { %1456 = vmatprep.mubr.f32.mxu0 %v59_v28  ;;  %1569 = vmatprep.mubr.f32.mxu1 %v2031_v51  ;;  %v2141_v39 = vpop.permute.xlu0 %190 }
  0xb2   :  { %1457 = vmatmul.mubr.f32.gmra.mrb[46].mxu0 %v59_v28  ;;  %1570 = vmatmul.mubr.f32.gmra.mrb[46].mxu1 %v2041_v55  ;;  %v2143_v40 = vpop.permute.xlu1 %205 }
  0xb3   :  { %v2145_v41 = vpop.permute.xlu0 %200 }
  0xb6   :  { %v2147_v42 = vpop.permute.xlu1 %215 }
  0xb7   :  { %v2149_v43 = vpop.permute.xlu0 %210 }
  0xba   :  { %v2151_v44 = vpop.permute.xlu1 %225 }
  0xbb   :  { %2558 = vst [vmem:[#allocation9_spill] sm:$0xff] %v2151_v44  ;;  %v2153_v45 = vpop.permute.xlu0 %220 }
  0xbc   :  { %2559 = vst [vmem:[#allocation10_spill] sm:$0xff] %v2153_v45 }
  0xbe   :  { %v2155_v46 = vpop.permute.xlu1 %910 }
  0xbf   :  { %v2157_v47 = vpop.permute.xlu0 %230 }
  0xc0   :  { %2560 = vst [vmem:[#allocation11_spill] sm:$0xff] %v2157_v47 }
  0xc2   :  { %v2159_v48 = vpop.permute.xlu1 %920 }
  0xc3   :  { %v2161_v49 = vpop.permute.xlu0 %915 }
  0xc6   :  { %v2163_v50 = vpop.permute.xlu1 %930 }
  0xc7   :  { %v2165_v51 = vpop.permute.xlu0 %925 }
  0xca   :  { %v2167_v52 = vpop.permute.xlu1 %940 }
  0xcb   :  { %v2169_v53 = vpop.permute.xlu0 %935 }
  0xce   :  { %v2171_v54 = vpop.permute.xlu1 %950 }
  0xcf   :  { %v2173_v55 = vpop.permute.xlu0 %945 }
  0xd2   :  { %v2175_v56 = vpop.permute.xlu1 %960 }
  0xd3   :  { %v2177_v57 = vpop.permute.xlu0 %955 }
  0xd6   :  { %v2179_v58 = vpop.permute.xlu1 %970 }
  0xd7   :  { %v2181_v59 = vpop.permute.xlu0 %965 }
  0xda   :  { %v2183_v60 = vpop.permute.xlu1 %980 }
  0xdb   :  { %v2185_v61 = vpop.permute.xlu0 %975 }
  0xde   :  { %v2187_v62 = vpop.permute.xlu1 %990 }
  0xdf   :  { %2561 = vst [vmem:[#allocation12_spill] sm:$0xff] %v2187_v62  ;;  %v2189_v63 = vpop.permute.xlu0 %985 }
  0xe2   :  { %v2191_v0 = vpop.permute.xlu1 %995 }
  0xe3   :  { %2562 = vst [vmem:[#allocation13_spill] sm:$0xff] %v2191_v0  ;;  %v2193_v32 = vpop.permute.xlu0 %235 }
  0xe4   :  { %2563 = vst [vmem:[#allocation14_spill] sm:$0xff] %v2193_v32 }
  0xe6   :  { %v2195_v1 = vpop.permute.xlu1 %1000 }
  0xe7   :  { %2564 = vst [vmem:[#allocation15_spill] sm:$0xff] %v2195_v1  ;;  %v2197_v2 = vpop.permute.xlu0 %240 }
  0xe8   :  { %2565 = vst [vmem:[#allocation16_spill] sm:$0xff] %v2197_v2 }
  0xea   :  { %v2199_v3 = vpop.permute.xlu1 %1005 }
  0xeb   :  { %2566 = vst [vmem:[#allocation17_spill] sm:$0xff] %v2199_v3  ;;  %v2201_v4 = vpop.permute.xlu0 %245 }
  0xec   :  { %2567 = vst [vmem:[#allocation18_spill] sm:$0xff] %v2201_v4 }
  0xee   :  { %v2203_v5 = vpop.permute.xlu1 %1010 }
  0xef   :  { %2568 = vst [vmem:[#allocation19_spill] sm:$0xff] %v2203_v5  ;;  %v2205_v6 = vpop.permute.xlu0 %250 }
  0xf0   :  { %2569 = vst [vmem:[#allocation20_spill] sm:$0xff] %v2205_v6 }
  0xf2   :  { %v2207_v7 = vpop.permute.xlu1 %1015 }
  0xf3   :  { %2570 = vst [vmem:[#allocation21_spill] sm:$0xff] %v2207_v7  ;;  %v2209_v8 = vpop.permute.xlu0 %255 }
  0xf4   :  { %2571 = vst [vmem:[#allocation22_spill] sm:$0xff] %v2209_v8 }
  0xf6   :  { %v2211_v9 = vpop.permute.xlu1 %1020 }
  0xf7   :  { %2572 = vst [vmem:[#allocation23_spill] sm:$0xff] %v2211_v9  ;;  %v2223_v25 = vpop.permute.xlu0 %260 }
  0xf8   :  { %2573 = vst [vmem:[#allocation24_spill] sm:$0xff] %v2223_v25 }
  0xfa   :  { %v2225_v26 = vpop.permute.xlu1 %1025 }
  0xfb   :  { %2574 = vst [vmem:[#allocation25_spill] sm:$0xff] %v2225_v26  ;;  %v2243_v47 = vpop.permute.xlu0 %265 }
  0xfc   :  { %2575 = vst [vmem:[#allocation26_spill] sm:$0xff] %v2243_v47 }
 0x129   :  { %v364_v10 = vpop.f32.mrb[0].mxu0  ;;  %v2213_v11 = vpop.f32.mrb[0].mxu1 }
 0x12a   :  { %v365_v12 = vadd.f32 %v364_v10, %v2114_v30  ;;  %v366_v13 = vpop.f32.mrb[1].mxu0  ;;  %v2216_v14 = vpop.f32.mrb[1].mxu1 }
 0x12b   :  { %v367_v15 = vadd.f32 %v366_v13, %v2114_v30 }
 0x12c   :  { %v780_v18 = vmax.f32 %v365_v12, 0.0 }
 0x12d   :  { %v370_v16 = vpop.f32.mrb[2].mxu0  ;;  %v2219_v17 = vpop.f32.mrb[2].mxu1  ;;  %v781_v22 = vmax.f32 %v367_v15, 0.0 }
 0x12e   :  { %v371_v19 = vadd.f32 %v370_v16, %v2120_v34  ;;  %v372_v20 = vpop.f32.mrb[3].mxu0  ;;  %v516_v21 = vpop.f32.mrb[3].mxu1  ;;  %v1068_v13 = vmul.f32 %v2155_v46, %v780_v18 }
 0x12f   :  { %v373_v24 = vadd.f32 %v372_v20, %v2120_v34  ;;  %v1069_v15 = vmul.f32 %v2155_v46, %v781_v22 }
 0x130   :  { %v783_v28 = vmax.f32 %v371_v19, 0.0 }
 0x131   :  { %v784_v10 = vmax.f32 %v373_v24, 0.0  ;;  %v376_v9 = vpop.f32.mrb[4].mxu0  ;;  %v520_v6 = vpop.f32.mrb[4].mxu1 }
 0x132   :  { %v1071_v5 = vmul.f32 %v2161_v49, %v783_v28  ;;  %v377_v12 = vadd.f32 %v376_v9, %v2111_v27  ;;  %v378_v16 = vpop.f32.mrb[5].mxu0  ;;  %v2230_v7 = vpop.f32.mrb[5].mxu1 }
 0x133   :  { %v1072_v20 = vmul.f32 %v2161_v49, %v784_v10  ;;  %v379_v8 = vadd.f32 %v378_v16, %v2111_v27 }
 0x134   :  { %v1164_v26 = vadd.f32 %v1071_v5, %v1068_v13  ;;  %v786_v19 = vmax.f32 %v377_v12, 0.0  ;;  %v2245_v5 = vpop.permute.xlu1 %1030 }
 0x135   :  { %v1201_v24 = vadd.f32 %v1072_v20, %v1069_v15  ;;  %v787_v2 = vmax.f32 %v379_v8, 0.0  ;;  %v382_v1 = vpop.f32.mrb[6].mxu0  ;;  %v2235_v4 = vpop.f32.mrb[6].mxu1 }
 0x136   :  { %v1074_v18 = vmul.f32 %v2159_v48, %v786_v19  ;;  %v383_v9 = vadd.f32 %v382_v1, %v2116_v31  ;;  %v384_v28 = vpop.f32.mrb[7].mxu0  ;;  %v2239_v3 = vpop.f32.mrb[7].mxu1 }
 0x137   :  { %v1075_v22 = vmul.f32 %v2159_v48, %v787_v2  ;;  %v385_v10 = vadd.f32 %v384_v28, %v2116_v31 }
 0x138   :  { %v1165_v13 = vadd.f32 %v1164_v26, %v1074_v18  ;;  %v789_v8 = vmax.f32 %v383_v9, 0.0 }
 0x139   :  { %v1202_v12 = vadd.f32 %v1201_v24, %v1075_v22  ;;  %v790_v16 = vmax.f32 %v385_v10, 0.0  ;;  %v388_v15 = vpop.f32.mrb[8].mxu0  ;;  %v2247_v20 = vpop.f32.mrb[8].mxu1 }
 0x13a   :  { %2576 = vst [vmem:[#allocation27_spill] sm:$0xff] %v2247_v20  ;;  %v1077_v1 = vmul.f32 %v2165_v51, %v789_v8  ;;  %v389_v19 = vadd.f32 %v388_v15, %v2128_v33  ;;  %v390_v32 = vpop.f32.mrb[9].mxu0  ;;  %v2251_v0 = vpop.f32.mrb[9].mxu1 }
 0x13b   :  { %2577 = vst [vmem:[#allocation28_spill] sm:$0xff] %v2251_v0  ;;  %v1078_v2 = vmul.f32 %v2165_v51, %v790_v16  ;;  %v391_v28 = vadd.f32 %v390_v32, %v2128_v33  ;;  %v509_v0 = vadd.f32 %v2213_v11, %v2223_v25 }
 0x13c   :  { %v1166_v62 = vadd.f32 %v1165_v13, %v1077_v1  ;;  %v792_v44 = vmax.f32 %v389_v19, 0.0  ;;  %v2265_v13 = vpop.permute.xlu0 %270  ;;  %v511_v1 = vadd.f32 %v2216_v14, %v2223_v25 }
 0x13d   :  { %v1203_v26 = vadd.f32 %v1202_v12, %v1078_v2  ;;  %v793_v18 = vmax.f32 %v391_v28, 0.0  ;;  %v394_v24 = vpop.f32.mrb[10].mxu0  ;;  %v2255_v9 = vpop.f32.mrb[10].mxu1  ;;  %v515_v2 = vadd.f32 %v2219_v17, %v2243_v47  ;;  %v517_v28 = vadd.f32 %v516_v21, %v2243_v47 }
 0x13e   :  { %2578 = vst [vmem:[#allocation29_spill] sm:$0xff] %v2255_v9  ;;  %v1080_v22 = vmul.f32 %v2163_v50, %v792_v44  ;;  %v395_v10 = vadd.f32 %v394_v24, %v2122_v35  ;;  %v396_v8 = vpop.f32.mrb[11].mxu0  ;;  %v2259_v15 = vpop.f32.mrb[11].mxu1  ;;  %v853_v21 = vmax.f32 %v511_v1, 0.0 }
 0x13f   :  { %2579 = vst [vmem:[#allocation30_spill] sm:$0xff] %v2259_v15  ;;  %v1081_v16 = vmul.f32 %v2163_v50, %v793_v18  ;;  %v397_v32 = vadd.f32 %v396_v8, %v2122_v35  ;;  %v2267_v12 = vpop.permute.xlu1 %1035  ;;  %v521_v8 = vadd.f32 %v520_v6, %v2265_v13  ;;  %v856_v6 = vmax.f32 %v517_v28, 0.0 }
 0x140   :  { %v1167_v44 = vadd.f32 %v1166_v62, %v1080_v22  ;;  %v795_v19 = vmax.f32 %v395_v10, 0.0  ;;  %v852_v62 = vmax.f32 %v509_v0, 0.0 }
 0x141   :  { %v1204_v24 = vadd.f32 %v1203_v26, %v1081_v16  ;;  %v796_v11 = vmax.f32 %v397_v32, 0.0  ;;  %v400_v15 = vpop.f32.mrb[12].mxu0  ;;  %v2274_v18 = vpop.f32.mrb[12].mxu1  ;;  %v523_v26 = vadd.f32 %v2230_v7, %v2265_v13  ;;  %v855_v32 = vmax.f32 %v515_v2, 0.0 }
 0x142   :  { %2580 = vst [vmem:[#allocation31_spill] sm:$0xff] %v2274_v18  ;;  %v1083_v9 = vmul.f32 %v2169_v53, %v795_v19  ;;  %v401_v20 = vadd.f32 %v400_v15, %v2133_v29  ;;  %v402_v45 = vpop.f32.mrb[13].mxu0  ;;  %v2279_v14 = vpop.f32.mrb[13].mxu1  ;;  %v858_v47 = vmax.f32 %v521_v8, 0.0  ;;  %v2292_v1 = vmul.f32 %v2245_v5, %v852_v62 }
 0x143   :  { %2581 = vst [vmem:[#allocation32_spill] sm:$0xff] %v2279_v14  ;;  %v1084_v22 = vmul.f32 %v2169_v53, %v796_v11  ;;  %v403_v17 = vadd.f32 %v402_v45, %v2133_v29  ;;  %v2301_v2 = vmul.f32 %v2245_v5, %v853_v21  ;;  %v859_v28 = vmax.f32 %v523_v26, 0.0 }
 0x144   :  { %v1168_v10 = vadd.f32 %v1167_v44, %v1083_v9  ;;  %v798_v16 = vmax.f32 %v401_v20, 0.0  ;;  %v2296_v9 = vpop.permute.xlu0 %275  ;;  %v2298_v44 = vpop.permute.xlu1 %1040  ;;  %v2304_v8 = vmul.f32 %v2267_v12, %v855_v32  ;;  %v2307_v62 = vmul.f32 %v2267_v12, %v856_v6 }
 0x145   :  { %v1205_v18 = vadd.f32 %v1204_v24, %v1084_v22  ;;  %v799_v19 = vmax.f32 %v403_v17, 0.0  ;;  %v406_v25 = vpop.f32.mrb[14].mxu0  ;;  %v2285_v15 = vpop.f32.mrb[14].mxu1  ;;  %v2317_v32 = vadd.f32 %v2235_v4, %v2296_v9 }
 0x146   :  { %v1086_v0 = vmul.f32 %v2167_v52, %v798_v16  ;;  %v407_v11 = vadd.f32 %v406_v25, %v2130_v23  ;;  %v408_v14 = vpop.f32.mrb[15].mxu0  ;;  %v2289_v45 = vpop.f32.mrb[15].mxu1  ;;  %2583 = vst [vmem:[#allocation34_spill] sm:$0xff] %v2307_v62 }
 0x147   :  { %2582 = vst [vmem:[#allocation33_spill] sm:$0xff] %v2289_v45  ;;  %v1087_v7 = vmul.f32 %v2167_v52, %v799_v19  ;;  %v409_v20 = vadd.f32 %v408_v14, %v2130_v23  ;;  %v2310_v19 = vmul.f32 %v2298_v44, %v858_v47  ;;  %v2323_v47 = vmul.f32 %v2298_v44, %v859_v28 }
 0x148   :  { %v1169_v25 = vadd.f32 %v1168_v10, %v1086_v0  ;;  %v801_v24 = vmax.f32 %v407_v11, 0.0 }
 0x149   :  { %v1206_v22 = vadd.f32 %v1205_v18, %v1087_v7  ;;  %v802_v17 = vmax.f32 %v409_v20, 0.0  ;;  %v412_v14 = vpop.f32.mrb[16].mxu0  ;;  %v1526_v16 = vpop.f32.mrb[16].mxu1  ;;  %2584 = vst [vmem:[#allocation35_spill] sm:$0xff] %v2310_v19  ;;  %2585 = vst [vmem:[#allocation36_spill] sm:$0xff] %v2323_v47 }
 0x14a   :  { %v1089_v45 = vmul.f32 %v2173_v55, %v801_v24  ;;  %v413_v21 = vadd.f32 %v412_v14, %v2137_v36  ;;  %v627_v26 = vadd.f32 %v1526_v16, %v2120_v34  ;;  %v414_v10 = vpop.f32.mrb[17].mxu0  ;;  %v621_v0 = vpop.f32.mrb[17].mxu1  ;;  %v2327_v34 = vadd.f32 %v2239_v3, %v2296_v9 }
 0x14b   :  { %v1090_v18 = vmul.f32 %v2173_v55, %v802_v17  ;;  %v415_v6 = vadd.f32 %v414_v10, %v2137_v36  ;;  %v622_v11 = vadd.f32 %v621_v0, %v2114_v30 }
 0x14c   :  { %v1170_v7 = vadd.f32 %v1169_v25, %v1089_v45  ;;  %v804_v20 = vmax.f32 %v413_v21, 0.0  ;;  %v785_v24 = vmax.f32 %v627_v26, 0.0 }
 0x14d   :  { %v1207_v14 = vadd.f32 %v1206_v22, %v1090_v18  ;;  %v805_v16 = vmax.f32 %v415_v6, 0.0  ;;  %v782_v4 = vmax.f32 %v622_v11, 0.0  ;;  %v418_v62 = vpop.f32.mrb[18].mxu0  ;;  %v1529_v19 = vpop.f32.mrb[18].mxu1 }
 0x14e   :  { %v1092_v17 = vmul.f32 %v2171_v54, %v804_v20  ;;  %v1073_v10 = vmul.f32 %v2161_v49, %v785_v24  ;;  %v419_v30 = vadd.f32 %v418_v62, %v2135_v37  ;;  %v637_v28 = vadd.f32 %v1529_v19, %v2116_v31  ;;  %v420_v45 = vpop.f32.mrb[19].mxu0  ;;  %v631_v25 = vpop.f32.mrb[19].mxu1 }
 0x14f   :  { %v1093_v21 = vmul.f32 %v2171_v54, %v805_v16  ;;  %v1070_v3 = vmul.f32 %v2155_v46, %v782_v4  ;;  %v421_v22 = vadd.f32 %v420_v45, %v2135_v37  ;;  %v632_v26 = vadd.f32 %v631_v25, %v2111_v27 }
 0x150   :  { %v1171_v0 = vadd.f32 %v1170_v7, %v1092_v17  ;;  %v1240_v18 = vsel %vm1238_vm0, %v1073_v10, 0.0  ;;  %v807_v6 = vmax.f32 %v419_v30, 0.0  ;;  %v791_v11 = vmax.f32 %v637_v28, 0.0 }
 0x151   :  { %v1208_v49 = vadd.f32 %v1207_v14, %v1093_v21  ;;  %v1239_v62 = vsel %vm1238_vm0, %v1070_v3, 0.0  ;;  %v808_v20 = vmax.f32 %v421_v22, 0.0  ;;  %v788_v31 = vmax.f32 %v632_v26, 0.0  ;;  %v424_v19 = vpop.f32.mrb[20].mxu0  ;;  %v1532_v24 = vpop.f32.mrb[20].mxu1 }
 0x152   :  { %v1241_v47 = vadd.f32 %v1240_v18, %v1239_v62  ;;  %v1095_v16 = vmul.f32 %v2177_v57, %v807_v6  ;;  %v1079_v46 = vmul.f32 %v2165_v51, %v791_v11  ;;  %v425_v4 = vadd.f32 %v424_v19, %v2141_v39  ;;  %v426_v27 = vpop.f32.mrb[21].mxu0  ;;  %v641_v7 = vpop.f32.mrb[21].mxu1 }
 0x153   :  { %v1096_v17 = vmul.f32 %v2177_v57, %v808_v20  ;;  %v1076_v10 = vmul.f32 %v2159_v48, %v788_v31  ;;  %v647_v14 = vadd.f32 %v1532_v24, %v2122_v35  ;;  %v427_v30 = vadd.f32 %v426_v27, %v2141_v39 }
 0x154   :  { %v1172_v28 = vadd.f32 %v1171_v0, %v1095_v16  ;;  %v1244_v45 = vsel %vm1238_vm0, %v1079_v46, 0.0  ;;  %v810_v25 = vmax.f32 %v425_v4, 0.0  ;;  %v642_v21 = vadd.f32 %v641_v7, %v2128_v33 }
 0x155   :  { %v1209_v3 = vadd.f32 %v1208_v49, %v1096_v17  ;;  %v1242_v51 = vsel %vm1238_vm0, %v1076_v10, 0.0  ;;  %v797_v22 = vmax.f32 %v647_v14, 0.0  ;;  %v811_v26 = vmax.f32 %v427_v30, 0.0  ;;  %v430_v18 = vpop.f32.mrb[22].mxu0  ;;  %v1535_v6 = vpop.f32.mrb[22].mxu1 }
 0x156   :  { %v1243_v11 = vadd.f32 %v1242_v51, %v1241_v47  ;;  %v1098_v48 = vmul.f32 %v2175_v56, %v810_v25  ;;  %v794_v62 = vmax.f32 %v642_v21, 0.0  ;;  %v431_v35 = vadd.f32 %v430_v18, %v2139_v38  ;;  %v432_v20 = vpop.f32.mrb[23].mxu0  ;;  %v651_v0 = vpop.f32.mrb[23].mxu1 }
 0x157   :  { %v1085_v31 = vmul.f32 %v2169_v53, %v797_v22  ;;  %v1099_v19 = vmul.f32 %v2175_v56, %v811_v26  ;;  %v657_v33 = vadd.f32 %v1535_v6, %v2130_v23  ;;  %v433_v49 = vadd.f32 %v432_v20, %v2139_v38 }
 0x158   :  { %v1173_v24 = vadd.f32 %v1172_v28, %v1098_v48  ;;  %v1082_v16 = vmul.f32 %v2163_v50, %v794_v62  ;;  %v1245_v46 = vadd.f32 %v1244_v45, %v1243_v11  ;;  %v813_v47 = vmax.f32 %v431_v35, 0.0 }
 0x159   :  { %v1248_v4 = vsel %vm1238_vm0, %v1085_v31, 0.0  ;;  %v1210_v27 = vadd.f32 %v1209_v3, %v1099_v19  ;;  %v803_v7 = vmax.f32 %v657_v33, 0.0  ;;  %v814_v17 = vmax.f32 %v433_v49, 0.0  ;;  %v436_v10 = vpop.f32.mrb[24].mxu0  ;;  %v1538_v14 = vpop.f32.mrb[24].mxu1 }
 0x15a   :  { %v1246_v53 = vsel %vm1238_vm0, %v1082_v16, 0.0  ;;  %v1101_v30 = vmul.f32 %v2181_v59, %v813_v47  ;;  %v652_v23 = vadd.f32 %v651_v0, %v2133_v29  ;;  %v437_v25 = vadd.f32 %v436_v10, %v2145_v41  ;;  %v438_v28 = vpop.f32.mrb[25].mxu0  ;;  %v661_v21 = vpop.f32.mrb[25].mxu1 }
 0x15b   :  { %v1247_v50 = vadd.f32 %v1246_v53, %v1245_v46  ;;  %v1091_v45 = vmul.f32 %v2173_v55, %v803_v7  ;;  %v1102_v51 = vmul.f32 %v2181_v59, %v814_v17  ;;  %v667_v3 = vadd.f32 %v1538_v14, %v2135_v37 }
 0x15c   :  { %v1174_v22 = vadd.f32 %v1173_v24, %v1101_v30  ;;  %v800_v26 = vmax.f32 %v652_v23, 0.0  ;;  %v816_v18 = vmax.f32 %v437_v25, 0.0  ;;  %v439_v6 = vadd.f32 %v438_v28, %v2145_v41 }
 0x15d   :  { %v1252_v11 = vsel %vm1238_vm0, %v1091_v45, 0.0  ;;  %v1211_v48 = vadd.f32 %v1210_v27, %v1102_v51  ;;  %v1249_v29 = vadd.f32 %v1248_v4, %v1247_v50  ;;  %v809_v62 = vmax.f32 %v667_v3, 0.0  ;;  %v442_v35 = vpop.f32.mrb[26].mxu0  ;;  %v1541_v20 = vpop.f32.mrb[26].mxu1 }
 0x15e   :  { %v1088_v0 = vmul.f32 %v2167_v52, %v800_v26  ;;  %v1104_v55 = vmul.f32 %v2179_v58, %v816_v18  ;;  %v817_v31 = vmax.f32 %v439_v6, 0.0  ;;  %v662_v19 = vadd.f32 %v661_v21, %v2137_v36  ;;  %v444_v37 = vpop.f32.mrb[27].mxu0  ;;  %v671_v33 = vpop.f32.mrb[27].mxu1 }
 0x15f   :  { %v1097_v49 = vmul.f32 %v2177_v57, %v809_v62  ;;  %v443_v24 = vadd.f32 %v442_v35, %v2143_v40  ;;  %v677_v16 = vadd.f32 %v1541_v20, %v2139_v38  ;;  %v445_v46 = vadd.f32 %v444_v37, %v2143_v40 }
 0x160   :  { %v1250_v47 = vsel %vm1238_vm0, %v1088_v0, 0.0  ;;  %v1175_v4 = vadd.f32 %v1174_v22, %v1104_v55  ;;  %v1105_v52 = vmul.f32 %v2179_v58, %v817_v31  ;;  %v806_v27 = vmax.f32 %v662_v19, 0.0 }
 0x161   :  { %v1251_v7 = vadd.f32 %v1250_v47, %v1249_v29  ;;  %v1256_v17 = vsel %vm1238_vm0, %v1097_v49, 0.0  ;;  %v819_v36 = vmax.f32 %v443_v24, 0.0  ;;  %v815_v10 = vmax.f32 %v677_v16, 0.0  ;;  %v448_v14 = vpop.f32.mrb[28].mxu0  ;;  %v1544_v53 = vpop.f32.mrb[28].mxu1 }
 0x162   :  { %v1212_v57 = vadd.f32 %v1211_v48, %v1105_v52  ;;  %v1094_v30 = vmul.f32 %v2171_v54, %v806_v27  ;;  %v820_v23 = vmax.f32 %v445_v46, 0.0  ;;  %v672_v38 = vadd.f32 %v671_v33, %v2141_v39  ;;  %v450_v25 = vpop.f32.mrb[29].mxu0  ;;  %v681_v28 = vpop.f32.mrb[29].mxu1 }
 0x163   :  { %v1253_v21 = vadd.f32 %v1252_v11, %v1251_v7  ;;  %v1107_v50 = vmul.f32 %v2185_v61, %v819_v36  ;;  %v1103_v45 = vmul.f32 %v2181_v59, %v815_v10  ;;  %v449_v51 = vadd.f32 %v448_v14, %v2149_v43 }
 0x164   :  { %v1254_v3 = vsel %vm1238_vm0, %v1094_v30, 0.0  ;;  %v1108_v22 = vmul.f32 %v2185_v61, %v820_v23  ;;  %v812_v26 = vmax.f32 %v672_v38, 0.0  ;;  %v687_v18 = vadd.f32 %v1544_v53, %v2143_v40 }
 0x165   :  { %v1255_v54 = vadd.f32 %v1254_v3, %v1253_v21  ;;  %v1176_v6 = vadd.f32 %v1175_v4, %v1107_v50  ;;  %v1260_v39 = vsel %vm1238_vm0, %v1103_v45, 0.0  ;;  %v822_v48 = vmax.f32 %v449_v51, 0.0  ;;  %v454_v29 = vpop.f32.mrb[30].mxu0  ;;  %v1547_v11 = vpop.f32.mrb[30].mxu1 }
 0x166   :  { %v1213_v62 = vadd.f32 %v1212_v57, %v1108_v22  ;;  %v1100_v35 = vmul.f32 %v2175_v56, %v812_v26  ;;  %v821_v59 = vmax.f32 %v687_v18, 0.0  ;;  %v451_v20 = vadd.f32 %v450_v25, %v2149_v43  ;;  %v456_v0 = vpop.f32.mrb[31].mxu0  ;;  %v691_v55 = vpop.f32.mrb[31].mxu1 }
 0x167   :  { %v1257_v31 = vadd.f32 %v1256_v17, %v1255_v54  ;;  %v1110_v19 = vmul.f32 %v2183_v60, %v822_v48  ;;  %v682_v40 = vadd.f32 %v681_v28, %v2145_v41  ;;  %v455_v37 = vadd.f32 %v454_v29, %v2147_v42  ;;  %v2586_v28 = vld [vmem:[#allocation10_spill] sm:$0xff] }
 0x168   :  { %v1258_v33 = vsel %vm1238_vm0, %v1100_v35, 0.0  ;;  %v1109_v49 = vmul.f32 %v2185_v61, %v821_v59  ;;  %v823_v24 = vmax.f32 %v451_v20, 0.0  ;;  %v697_v16 = vadd.f32 %v1547_v11, %v2147_v42  ;;  %v2588_v20 = vld [vmem:[#allocation12_spill] sm:$0xff] }
 0x169   :  { %v1259_v56 = vadd.f32 %v1258_v33, %v1257_v31  ;;  %v1177_v46 = vadd.f32 %v1176_v6, %v1110_v19  ;;  %v818_v47 = vmax.f32 %v682_v40, 0.0  ;;  %v825_v4 = vmax.f32 %v455_v37, 0.0  ;;  %v460_v52 = vpop.f32.mrb[32].mxu0  ;;  %v1550_v27 = vpop.f32.mrb[32].mxu1  ;;  %v2589_v19 = vld [vmem:[#allocation13_spill] sm:$0xff] }
 0x16a   :  { %v1264_v7 = vsel %vm1238_vm0, %v1109_v49, 0.0  ;;  %v1111_v17 = vmul.f32 %v2183_v60, %v823_v24  ;;  %v827_v41 = vmax.f32 %v697_v16, 0.0  ;;  %v457_v36 = vadd.f32 %v456_v0, %v2147_v42  ;;  %v462_v10 = vpop.f32.mrb[33].mxu0  ;;  %v701_v14 = vpop.f32.mrb[33].mxu1  ;;  %v2587_v42 = vld [vmem:[#allocation9_spill] sm:$0xff] }
 0x16b   :  { %v1106_v61 = vmul.f32 %v2179_v58, %v818_v47  ;;  %v1261_v53 = vadd.f32 %v1260_v39, %v1259_v56  ;;  %v1113_v57 = vmul.f32 %v2189_v63, %v825_v4  ;;  %v692_v30 = vadd.f32 %v691_v55, %v2149_v43  ;;  %v2590_v56 = vld [vmem:[#allocation14_spill] sm:$0xff] }
 0x16c   :  { %v1214_v23 = vadd.f32 %v1213_v62, %v1111_v17  ;;  %v1115_v38 = vmul.f32 %v2189_v63, %v827_v41  ;;  %v826_v25 = vmax.f32 %v457_v36, 0.0  ;;  %v461_v21 = vadd.f32 %v460_v52, %v2586_v28  ;;  %v2417_v41 = vpop.permute.xlu0 %280 }
 0x16d   :  { %v1262_v50 = vsel %vm1238_vm0, %v1106_v61, 0.0  ;;  %v1178_v45 = vadd.f32 %v1177_v46, %v1113_v57  ;;  %v824_v51 = vmax.f32 %v692_v30, 0.0  ;;  %v707_v3 = vadd.f32 %v1550_v27, %v2587_v42  ;;  %v466_v22 = vpop.f32.mrb[34].mxu0  ;;  %v1553_v26 = vpop.f32.mrb[34].mxu1  ;;  %v2591_v61 = vld [vmem:[#allocation11_spill] sm:$0xff] }
 0x16e   :  { %v1263_v58 = vadd.f32 %v1262_v50, %v1261_v53  ;;  %v1268_v18 = vsel %vm1238_vm0, %v1115_v38, 0.0  ;;  %v1114_v54 = vmul.f32 %v2189_v63, %v826_v25  ;;  %v828_v43 = vmax.f32 %v461_v21, 0.0  ;;  %v468_v6 = vpop.f32.mrb[35].mxu0  ;;  %v711_v39 = vpop.f32.mrb[35].mxu1 }
 0x16f   :  { %v1112_v48 = vmul.f32 %v2183_v60, %v824_v51  ;;  %v833_v29 = vmax.f32 %v707_v3, 0.0  ;;  %v463_v11 = vadd.f32 %v462_v10, %v2586_v28  ;;  %v702_v62 = vadd.f32 %v701_v14, %v2586_v28 }
 0x170   :  { %v1215_v35 = vadd.f32 %v1214_v23, %v1114_v54  ;;  %v1265_v59 = vadd.f32 %v1264_v7, %v1263_v58  ;;  %v1116_v0 = vmul.f32 %v2588_v20, %v828_v43  ;;  %v467_v55 = vadd.f32 %v466_v22, %v2587_v42 }
 0x171   :  { %v1266_v31 = vsel %vm1238_vm0, %v1112_v48, 0.0  ;;  %v1121_v63 = vmul.f32 %v2589_v19, %v833_v29  ;;  %v829_v40 = vmax.f32 %v463_v11, 0.0  ;;  %v830_v37 = vmax.f32 %v702_v62, 0.0  ;;  %v472_v33 = vpop.f32.mrb[36].mxu0  ;;  %v1556_v49 = vpop.f32.mrb[36].mxu1  ;;  %v2595_v11 = vld [vmem:[#allocation16_spill] sm:$0xff] }
 0x172   :  { %v1267_v60 = vadd.f32 %v1266_v31, %v1265_v59  ;;  %v1179_v24 = vadd.f32 %v1178_v45, %v1116_v0  ;;  %v831_v16 = vmax.f32 %v467_v55, 0.0  ;;  %v717_v46 = vadd.f32 %v1553_v26, %v2590_v56  ;;  %v474_v47 = vpop.f32.mrb[37].mxu0  ;;  %v721_v4 = vpop.f32.mrb[37].mxu1  ;;  %v2592_v45 = vld [vmem:[#allocation17_spill] sm:$0xff] }
 0x173   :  { %v1272_v52 = vsel %vm1238_vm0, %v1121_v63, 0.0  ;;  %v1117_v27 = vmul.f32 %v2588_v20, %v829_v40  ;;  %v1118_v7 = vmul.f32 %v2588_v20, %v830_v37  ;;  %v469_v17 = vadd.f32 %v468_v6, %v2587_v42  ;;  %v2596_v37 = vld [vmem:[#allocation22_spill] sm:$0xff] }
 0x174   :  { %v1269_v36 = vadd.f32 %v1268_v18, %v1267_v60  ;;  %v1119_v10 = vmul.f32 %v2589_v19, %v831_v16  ;;  %v839_v14 = vmax.f32 %v717_v46, 0.0  ;;  %v712_v53 = vadd.f32 %v711_v39, %v2591_v61  ;;  %v2593_v18 = vld [vmem:[#allocation18_spill] sm:$0xff]  ;;  %v2594_v39 = vld [vmem:[#allocation15_spill] sm:$0xff]  ;;  %v2597_v46 = vld [vmem:[#allocation21_spill] sm:$0xff] }
 0x175   :  { %v1216_v57 = vadd.f32 %v1215_v35, %v1117_v27  ;;  %v1270_v30 = vsel %vm1238_vm0, %v1118_v7, 0.0  ;;  %v832_v23 = vmax.f32 %v469_v17, 0.0  ;;  %v473_v38 = vadd.f32 %v472_v33, %v2591_v61  ;;  %v478_v25 = vpop.f32.mrb[38].mxu0  ;;  %v1559_v28 = vpop.f32.mrb[38].mxu1  ;;  %v2598_v27 = vld [vmem:[#allocation19_spill] sm:$0xff] }
 0x176   :  { %v1271_v21 = vadd.f32 %v1270_v30, %v1269_v36  ;;  %v1180_v50 = vadd.f32 %v1179_v24, %v1119_v10  ;;  %v1127_v51 = vmul.f32 %v2592_v45, %v839_v14  ;;  %v836_v42 = vmax.f32 %v712_v53, 0.0  ;;  %v480_v3 = vpop.f32.mrb[39].mxu0  ;;  %v731_v22 = vpop.f32.mrb[39].mxu1 }
 0x177   :  { %v1120_v26 = vmul.f32 %v2589_v19, %v832_v23  ;;  %v834_v58 = vmax.f32 %v473_v38, 0.0  ;;  %v727_v54 = vadd.f32 %v1556_v49, %v2593_v18  ;;  %v475_v43 = vadd.f32 %v474_v47, %v2591_v61 }
 0x178   :  { %v1276_v6 = vsel %vm1238_vm0, %v1127_v51, 0.0  ;;  %v1124_v48 = vmul.f32 %v2594_v39, %v836_v42  ;;  %v1273_v29 = vadd.f32 %v1272_v52, %v1271_v21  ;;  %v722_v62 = vadd.f32 %v721_v4, %v2595_v11  ;;  %v2436_v52 = vpop.permute.xlu0 %285 }
 0x179   :  { %v1217_v35 = vadd.f32 %v1216_v57, %v1120_v26  ;;  %v1122_v59 = vmul.f32 %v2594_v39, %v834_v58  ;;  %v845_v20 = vmax.f32 %v727_v54, 0.0  ;;  %v835_v0 = vmax.f32 %v475_v43, 0.0  ;;  %v484_v55 = vpop.f32.mrb[40].mxu0  ;;  %v1562_v31 = vpop.f32.mrb[40].mxu1  ;;  %v2599_v57 = vld [vmem:[#allocation20_spill] sm:$0xff] }
 0x17a   :  { %v1274_v19 = vsel %vm1238_vm0, %v1124_v48, 0.0  ;;  %v842_v63 = vmax.f32 %v722_v62, 0.0  ;;  %v479_v40 = vadd.f32 %v478_v25, %v2590_v56  ;;  %v737_v33 = vadd.f32 %v1559_v28, %v2596_v37  ;;  %v486_v49 = vpop.f32.mrb[41].mxu0  ;;  %v741_v60 = vpop.f32.mrb[41].mxu1  ;;  %v2602_v62 = vld [vmem:[#allocation23_spill] sm:$0xff] }
 0x17b   :  { %v1275_v24 = vadd.f32 %v1274_v19, %v1273_v29  ;;  %v1181_v16 = vadd.f32 %v1180_v50, %v1122_v59  ;;  %v1133_v47 = vmul.f32 %v2597_v46, %v845_v20  ;;  %v1123_v4 = vmul.f32 %v2594_v39, %v835_v0  ;;  %v2447_v43 = vpop.permute.xlu1 %1045 }
 0x17c   :  { %v1130_v7 = vmul.f32 %v2598_v27, %v842_v63  ;;  %v837_v17 = vmax.f32 %v479_v40, 0.0  ;;  %v851_v36 = vmax.f32 %v737_v33, 0.0  ;;  %v481_v10 = vadd.f32 %v480_v3, %v2590_v56  ;;  %v2600_v3 = vld [vmem:[#allocation26_spill] sm:$0xff]  ;;  %v2603_v33 = vld [vmem:[#allocation24_spill] sm:$0xff] }
 0x17d   :  { %v861_v14 = vmax.f32 %v2317_v32, 0.0  ;;  %v1218_v61 = vadd.f32 %v1217_v35, %v1123_v4  ;;  %v1277_v53 = vadd.f32 %v1276_v6, %v1275_v24  ;;  %v732_v30 = vadd.f32 %v731_v22, %v2599_v57  ;;  %v490_v23 = vpop.f32.mrb[42].mxu0  ;;  %v1565_v38 = vpop.f32.mrb[42].mxu1  ;;  %v2601_v6 = vld [vmem:[#allocation25_spill] sm:$0xff]  ;;  %v2611_v32 = vld [vmem:[#allocation34_spill] sm:$0xff] }
 0x17e   :  { %v1280_v25 = vsel %vm1238_vm0, %v1133_v47, 0.0  ;;  %v1278_v28 = vsel %vm1238_vm0, %v1130_v7, 0.0  ;;  %v1125_v21 = vmul.f32 %v2592_v45, %v837_v17  ;;  %v838_v50 = vmax.f32 %v481_v10, 0.0  ;;  %v492_v51 = vpop.f32.mrb[43].mxu0  ;;  %v751_v42 = vpop.f32.mrb[43].mxu1 }
 0x17f   :  { %v1279_v26 = vadd.f32 %v1278_v28, %v1277_v53  ;;  %v848_v58 = vmax.f32 %v732_v30, 0.0  ;;  %v485_v56 = vadd.f32 %v484_v55, %v2595_v11  ;;  %v747_v54 = vadd.f32 %v1562_v31, %v2600_v3  ;;  %v2459_v7 = vpop.permute.xlu0 %290 }
 0x180   :  { %v1182_v22 = vadd.f32 %v1181_v16, %v1125_v21  ;;  %v1139_v39 = vmul.f32 %v2601_v6, %v851_v36  ;;  %v1126_v48 = vmul.f32 %v2592_v45, %v838_v50  ;;  %v487_v29 = vadd.f32 %v486_v49, %v2595_v11 }
 0x181   :  { %v1136_v35 = vmul.f32 %v2602_v62, %v848_v58  ;;  %v1281_v59 = vadd.f32 %v1280_v25, %v1279_v26  ;;  %v840_v20 = vmax.f32 %v485_v56, 0.0  ;;  %v857_v0 = vmax.f32 %v747_v54, 0.0  ;;  %v496_v19 = vpop.f32.mrb[44].mxu0  ;;  %v1568_v63 = vpop.f32.mrb[44].mxu1 }
 0x182   :  { %v1219_v40 = vadd.f32 %v1218_v61, %v1126_v48  ;;  %v841_v55 = vmax.f32 %v487_v29, 0.0  ;;  %v742_v31 = vadd.f32 %v741_v60, %v2603_v33  ;;  %v491_v24 = vadd.f32 %v490_v23, %v2593_v18  ;;  %v498_v16 = vpop.f32.mrb[45].mxu0  ;;  %v761_v47 = vpop.f32.mrb[45].mxu1 }
 0x183   :  { %v1282_v4 = vsel %vm1238_vm0, %v1136_v35, 0.0  ;;  %v1128_v45 = vmul.f32 %v2598_v27, %v840_v20  ;;  %v1145_v11 = vmul.f32 %v2267_v12, %v857_v0  ;;  %v757_v49 = vadd.f32 %v1565_v38, %v2296_v9  ;;  %v2466_v58 = vpop.permute.xlu1 %1050 }
 0x184   :  { %v1283_v17 = vadd.f32 %v1282_v4, %v1281_v59  ;;  %v1129_v36 = vmul.f32 %v2598_v27, %v841_v55  ;;  %v854_v10 = vmax.f32 %v742_v31, 0.0  ;;  %v843_v61 = vmax.f32 %v491_v24, 0.0 }
 0x185   :  { %v1284_v60 = vsel %vm1238_vm0, %v1139_v39, 0.0  ;;  %v1183_v53 = vadd.f32 %v1182_v22, %v1128_v45  ;;  %v863_v30 = vmax.f32 %v757_v49, 0.0  ;;  %v493_v23 = vadd.f32 %v492_v51, %v2593_v18  ;;  %v502_v25 = vpop.f32.mrb[46].mxu0  ;;  %v1571_v28 = vpop.f32.mrb[46].mxu1 }
 0x186   :  { %v1220_v21 = vadd.f32 %v1219_v40, %v1129_v36  ;;  %v1142_v12 = vmul.f32 %v2245_v5, %v854_v10  ;;  %v1285_v50 = vadd.f32 %v1284_v60, %v1283_v17  ;;  %v1131_v9 = vmul.f32 %v2597_v46, %v843_v61  ;;  %v504_v38 = vpop.f32.mrb[47].mxu0  ;;  %v771_v26 = vpop.f32.mrb[47].mxu1 }
 0x187   :  { %v1288_v27 = vsel %vm1238_vm0, %v1145_v11, 0.0  ;;  %v844_v56 = vmax.f32 %v493_v23, 0.0  ;;  %v752_v3 = vadd.f32 %v751_v42, %v2265_v13  ;;  %v497_v54 = vadd.f32 %v496_v19, %v2599_v57 }
 0x188   :  { %v1286_v18 = vsel %vm1238_vm0, %v1142_v12, 0.0  ;;  %v1184_v51 = vadd.f32 %v1183_v53, %v1131_v9  ;;  %v767_v22 = vadd.f32 %v1568_v63, %v2436_v52  ;;  %v499_v5 = vadd.f32 %v498_v16, %v2599_v57  ;;  %v296_v63 = vpop.permute.xlu0 %295  ;;  %v2604_v57 = vld [vmem:[#allocation27_spill] sm:$0xff]  ;;  %v1056_v16 = vpop.permute.xlu1 %1055 }
 0x189   :  { %v1287_v39 = vadd.f32 %v1286_v18, %v1285_v50  ;;  %v1151_v48 = vmul.f32 %v2447_v43, %v863_v30  ;;  %v1132_v29 = vmul.f32 %v2597_v46, %v844_v56  ;;  %v860_v35 = vmax.f32 %v752_v3, 0.0  ;;  %v2607_v18 = vld [vmem:[#allocation30_spill] sm:$0xff] }
 0x18a   :  { %v846_v59 = vmax.f32 %v497_v54, 0.0  ;;  %v869_v20 = vmax.f32 %v767_v22, 0.0  ;;  %v847_v0 = vmax.f32 %v499_v5, 0.0  ;;  %v762_v13 = vadd.f32 %v761_v47, %v2417_v41  ;;  %v2608_v5 = vld [vmem:[#allocation31_spill] sm:$0xff] }
 0x18b   :  { %v1221_v42 = vadd.f32 %v1220_v21, %v1132_v29  ;;  %v1148_v19 = vmul.f32 %v2298_v44, %v860_v35  ;;  %v1289_v40 = vadd.f32 %v1288_v27, %v1287_v39  ;;  %v503_v55 = vadd.f32 %v502_v25, %v2596_v37 }
 0x18c   :  { %v533_v33 = vadd.f32 %v2604_v57, %v2417_v41  ;;  %v1134_v31 = vmul.f32 %v2602_v62, %v846_v59  ;;  %v1135_v46 = vmul.f32 %v2602_v62, %v847_v0  ;;  %v866_v24 = vmax.f32 %v762_v13, 0.0  ;;  %v1061_v54 = vpop.permute.xlu0 %1060 }
 0x18d   :  { %v1290_v4 = vsel %vm1238_vm0, %v1148_v19, 0.0  ;;  %v849_v45 = vmax.f32 %v503_v55, 0.0  ;;  %v777_v47 = vadd.f32 %v1571_v28, %v296_v63  ;;  %v505_v11 = vadd.f32 %v504_v38, %v2596_v37  ;;  %v2605_v28 = vld [vmem:[#allocation28_spill] sm:$0xff]  ;;  %v2606_v38 = vld [vmem:[#allocation29_spill] sm:$0xff]  ;;  %v2610_v55 = vld [vmem:[#allocation35_spill] sm:$0xff] }
 0x18e   :  { %v1292_v44 = vsel %vm1238_vm0, %v1151_v48, 0.0  ;;  %v1291_v49 = vadd.f32 %v1290_v4, %v1289_v40  ;;  %v1185_v17 = vadd.f32 %v1184_v51, %v1134_v31  ;;  %v1222_v36 = vadd.f32 %v1221_v42, %v1135_v46  ;;  %v2612_v46 = vld [vmem:[#allocation33_spill] sm:$0xff] }
 0x18f   :  { %v1157_v10 = vmul.f32 %v1056_v16, %v869_v20  ;;  %v1154_v61 = vmul.f32 %v2466_v58, %v866_v24  ;;  %v1137_v60 = vmul.f32 %v2601_v6, %v849_v45  ;;  %v850_v53 = vmax.f32 %v505_v11, 0.0  ;;  %v2613_v45 = vld [vmem:[#allocation36_spill] sm:$0xff] }
 0x190   :  { %v862_v62 = vmax.f32 %v2327_v34, 0.0  ;;  %v1293_v30 = vadd.f32 %v1292_v44, %v1291_v49  ;;  %v875_v23 = vmax.f32 %v777_v47, 0.0  ;;  %v772_v25 = vadd.f32 %v771_v26, %v2459_v7  ;;  %v1066_v34 = vpop.permute.xlu1 %1065 }
 0x191   :  { %v535_v37 = vadd.f32 %v2605_v28, %v2417_v41  ;;  %v1294_v21 = vsel %vm1238_vm0, %v1154_v61, 0.0  ;;  %v1186_v12 = vadd.f32 %v1185_v17, %v1137_v60  ;;  %v1138_v50 = vmul.f32 %v2601_v6, %v850_v53 }
 0x192   :  { %v864_v9 = vmax.f32 %v533_v33, 0.0  ;;  %v539_v27 = vadd.f32 %v2606_v38, %v2436_v52  ;;  %v1295_v56 = vadd.f32 %v1294_v21, %v1293_v30  ;;  %v872_v3 = vmax.f32 %v772_v25, 0.0 }
 0x193   :  { %v541_v51 = vadd.f32 %v2607_v18, %v2436_v52  ;;  %v1296_v26 = vsel %vm1238_vm0, %v1157_v10, 0.0  ;;  %v1187_v41 = vadd.f32 %v1186_v12, %v2292_v1  ;;  %v1223_v22 = vadd.f32 %v1222_v36, %v1138_v50  ;;  %v2609_v1 = vld [vmem:[#allocation32_spill] sm:$0xff] }
 0x194   :  { %v545_v39 = vadd.f32 %v2608_v5, %v2459_v7  ;;  %v1163_v6 = vmul.f32 %v1066_v34, %v875_v23  ;;  %v1160_v48 = vmul.f32 %v1061_v54, %v872_v3  ;;  %v1297_v29 = vadd.f32 %v1296_v26, %v1295_v56 }
 0x195   :  { %v1149_v35 = vmul.f32 %v2447_v43, %v861_v14  ;;  %v1150_v59 = vmul.f32 %v2447_v43, %v862_v62  ;;  %v1188_v20 = vadd.f32 %v1187_v41, %v2304_v8  ;;  %v1224_v52 = vadd.f32 %v1223_v22, %v2301_v2 }
 0x196   :  { %v865_v0 = vmax.f32 %v535_v37, 0.0  ;;  %v867_v13 = vmax.f32 %v539_v27, 0.0  ;;  %v547_v42 = vadd.f32 %v2609_v1, %v2459_v7  ;;  %v1298_v19 = vsel %vm1238_vm0, %v1160_v48, 0.0 }
 0x197   :  { %v551_v40 = vadd.f32 %v2285_v15, %v296_v63  ;;  %v1189_v57 = vadd.f32 %v1188_v20, %v2610_v55  ;;  %v1225_v33 = vadd.f32 %v1224_v52, %v2611_v32  ;;  %v1299_v14 = vadd.f32 %v1298_v19, %v1297_v29 }
 0x198   :  { %v1152_v43 = vmul.f32 %v2466_v58, %v864_v9  ;;  %v868_v31 = vmax.f32 %v541_v51, 0.0  ;;  %v870_v8 = vmax.f32 %v545_v39, 0.0  ;;  %v1300_v2 = vsel %vm1238_vm0, %v1163_v6, 0.0 }
 0x199   :  { %v553_v24 = vadd.f32 %v2612_v46, %v296_v63  ;;  %v1190_v4 = vadd.f32 %v1189_v57, %v1149_v35  ;;  %v1226_v7 = vadd.f32 %v1225_v33, %v2613_v45  ;;  %v1301_v47 = vadd.f32 %v1300_v2, %v1299_v14 }
 0x19a   :  { %v1153_v11 = vmul.f32 %v2466_v58, %v865_v0  ;;  %v1155_v15 = vmul.f32 %v1056_v16, %v867_v13  ;;  %v871_v44 = vmax.f32 %v547_v42, 0.0  ;;  %v873_v49 = vmax.f32 %v551_v40, 0.0 }
 0x19b   :  { %v1191_v17 = vadd.f32 %v1190_v4, %v1152_v43  ;;  %v1227_v36 = vadd.f32 %v1226_v7, %v1150_v59  ;;  %v1302_v10 = vrot.slane %v1301_v47, 4  ;;  %v1156_v61 = vmul.f32 %v1056_v16, %v868_v31 }
 0x19c   :  { %v1158_v60 = vmul.f32 %v1061_v54, %v870_v8  ;;  %v874_v53 = vmax.f32 %v553_v24, 0.0  ;;  %v1159_v25 = vmul.f32 %v1061_v54, %v871_v44  ;;  %v1161_v63 = vmul.f32 %v1066_v34, %v873_v49 }
 0x19d   :  { %v1192_v62 = vadd.f32 %v1191_v17, %v1155_v15  ;;  %v1228_v30 = vadd.f32 %v1227_v36, %v1153_v11  ;;  %v1303_v23 = vadd.f32 %v1302_v10, %v1301_v47  ;;  %v1309_v16 = vstv %s2538_s4  ;;  %s1705_s4 = smov [#allocation6]  }
 0x19e   :  { %v1162_v12 = vmul.f32 %v1066_v34, %v874_v53  ;;  %v1704_v14 = vmov 1966171168   ;;  %v1338_v31 = vlaneseq  ;;  %s1369_s26 = sshll.u32 %s1705_s4, 4  ;;  %s1370_s26 = int_to_ptr.vmem [resolvable:$true] %s1369_s26 }
 0x19f   :  { %v1193_v28 = vadd.f32 %v1192_v62, %v1158_v60  ;;  %v1229_v37 = vadd.f32 %v1228_v30, %v1156_v61  ;;  %v1304_v21 = vrot.slane %v1303_v23, 2  ;;  %v1336_v43 = vunpack.c.l.s4 %v1704_v14  ;;  %s1674_s27 = scalar_lea.vmem %s1370_s26, 48  ;;  %s1678_s0 = scalar_lea.vmem %s1370_s26, 64 }
 0x1a0   :  { %v1339_v2 = vshrl.u32 %v1338_v31, 7  ;;  %vm1360_vm1 = vcmp.lt.s32.totalorder %v1338_v31, 304  ;;  %p1675_p8 = scmp.ne.s32.totalorder %s1370_s26, %s1674_s27  ;;  %p1679_p9 = scmp.lt.s32.totalorder %s1370_s26, %s1370_s26 }
 0x1a1   :  { %v1194_v50 = vadd.f32 %v1193_v28, %v1161_v63  ;;  %v1230_v58 = vadd.f32 %v1229_v37, %v1159_v25  ;;  %v1305_v9 = vadd.f32 %v1304_v21, %v1303_v23  ;;  %v1337_v8 = vunpack.c.0.s8 %v1336_v43  ;;  %p1680_p10 = scmp.lt.s32.totalorder %s1678_s0, %s1674_s27 }
 0x1a3   :  { %v1195_v38 = vrot.slane %v1194_v50, 4  ;;  %v1231_v27 = vadd.f32 %v1230_v58, %v1162_v12  ;;  %v1306_v56 = vrot.slane %v1305_v9, 1  ;;  %v1340_v4 = vsub.s32 %v1337_v8, %v1339_v2  ;;  %p1681_p11 = por %p1680_p10, %p1679_p9 }
 0x1a5   :  { %v1196_v3 = vadd.f32 %v1195_v38, %v1194_v50  ;;  %v1232_v18 = vrot.slane %v1231_v27, 4  ;;  %v1307_v51 = vadd.f32 %v1306_v56, %v1305_v9  ;;  %p1682_p12 = pnand %p1681_p11, %p1675_p8 }
 0x1a7   :  { %v1197_v26 = vrot.slane %v1196_v3, 2  ;;  %v1233_v54 = vadd.f32 %v1232_v18, %v1231_v27  ;;  %v1312_v41 = vadd.f32 %v1309_v16, %v1307_v51 }
 0x1a9   :  { %v1234_v22 = vrot.slane %v1233_v54, 2  ;;  %v1198_v5 = vadd.f32 %v1197_v26, %v1196_v3  ;;  %v1315_v39 = vsub.f32 0.0, %v1312_v41 }
 0x1ab   :  { %v1199_v34 = vrot.slane %v1198_v5, 1  ;;  %v1235_v6 = vadd.f32 %v1234_v22, %v1233_v54  ;;  %v1320_v35 = vmul.f32 1.442695, %v1315_v39 }
 0x1ad   :  { %v1200_v48 = vadd.f32 %v1199_v34, %v1198_v5  ;;  %v1236_v29 = vrot.slane %v1235_v6, 1  ;;  %1640 = vpow2.f32 %v1320_v35 }
 0x1af   :  { %v1237_v59 = vadd.f32 %v1236_v29, %v1235_v6  ;;  %v1310_v20 = vadd.f32 %v1309_v16, %v1200_v48 }
 0x1b1   :  { %v1311_v52 = vadd.f32 %v1309_v16, %v1237_v59  ;;  %v1313_v0 = vsub.f32 0.0, %v1310_v20 }
 0x1b3   :  { %v1314_v13 = vsub.f32 0.0, %v1311_v52  ;;  %v1316_v1 = vmul.f32 1.442695, %v1313_v0 }
 0x1b5   :  { %1642 = vpow2.f32 %v1316_v1  ;;  %v1318_v42 = vmul.f32 1.442695, %v1314_v13 }
 0x1b7   :  { %1644 = vpow2.f32 %v1318_v42  ;;  %v1641_v19 = vpop.eup %1640 }
 0x1b8   :  { %v1324_v55 = vadd.f32 1.0, %v1641_v19 }
 0x1bf   :  { %v1643_v40 = vpop.eup %1642 }
 0x1c0   :  { %v1322_v57 = vadd.f32 1.0, %v1643_v40 }
 0x1c1   :  { %v1645_v32 = vpop.eup %1644 }
 0x1c2   :  { %v1323_v33 = vadd.f32 1.0, %v1645_v32  ;;  %1646 = vrcp.f32 %v1322_v57 }
 0x1c3   :  { %1648 = vrcp.f32 %v1324_v55 }
 0x1c4   :  { %1650 = vrcp.f32 %v1323_v33 }
 0x1cc   :  { %v1647_v46 = vpop.eup %1646 }
 0x1cd   :  { %v1649_v24 = vpop.eup %1648 }
 0x1ce   :  { %v1651_v45 = vpop.eup %1650  ;;  %v1348_v11 = vrot.slane %v1649_v24, %v1340_v4 }
 0x1cf   :  { %v1334_v7 = vcombine.low %v1647_v46, %v1651_v45 }
 0x1d1   :  { %v1341_v47 = vrot.slane %v1334_v7, %v1340_v4 }
 0x1d3   :  { %v1349_v15 = vcombine.low %v1341_v47, %v1348_v11 }
 0x1d5   :  { %v1356_v44 = vrot.slane %v1349_v15, %v1340_v4 }
 0x1d7   :  { %1362 = vst.msk [vmem:[#allocation6] sm:$0x7] %vm1360_vm1, %v1356_v44 }
 0x1d8   :  { %1685 = shalt.err (!%p1682_p12)
}
 0x1d9   :  { %s1686_s30 = scalar_lea.hbm %s2539_s5, 48 }
 0x1da   :  { %p1687_p13 = scmp.ne.s32.totalorder %s2539_s5, %s1686_s30  ;;  %p1690_p0 = scmp.lt.u32.totalorder %s1686_s30, %s2539_s5 }
 0x1dc   :  { %p1692_p1 = pnand %p1690_p0, %p1687_p13 }
 0x1de   :  { %1695 = shalt.err (!%p1692_p1)
}
 0x1df   :  { %1372 = dma.vmem_to_hbm [thread:$0]  %s1370_s26, 48, %s2539_s5, [#allocation5]  }
 0x1e0   :  { %1698 = dma.done.wait [#allocation5], 48  }
 0x1e1   :  { %1699 = vsyncadd [#allocation5], 4294967248 }
 0x1e2   :  { %1376 = vsyncpa [#allocation4], 1 }
 0x1e3   :  { %1377 = vsyncpa [#allocation5], 1 }

</bundles_post_ra>
